<compile_context>
chip_gen: v5e
topology: v5e:2x2
jax: 0.10.0
libtpu: 0.0.40
codegen_flags: <defaults>
</compile_context>

<pallas_src>
import functools

import jax
import jax.numpy as jnp
from jax.experimental import pallas as pl
from jax.experimental.pallas import tpu as pltpu


def _round_up(x, m):
    return ((x + m - 1) // m) * m


def _pointnet_kernel(x_ref, w1_ref, sh1_ref, w2_ref, sh2_ref, w3_ref, sh3_ref,
                     out_ref, acc_ref, *, cin_small):
    n = pl.program_id(1)

    @pl.when(n == 0)
    def _init():
        acc_ref[...] = jnp.full(acc_ref.shape, -jnp.inf, jnp.float32)

    tb, tn, cin = x_ref.shape
    rows = tb * tn
    x = x_ref[...].reshape(rows, cin)

    if cin_small:
        # conv1 on the VPU: K (= inc, e.g. 3) is far too small for a useful
        # MXU pass, and the FLOPs are negligible.
        xf = x.astype(jnp.float32)
        w1 = w1_ref[...]                                   # (cin, C1) f32
        h = xf[:, 0:1] * w1[0:1, :]
        for c in range(1, cin):
            h = h + xf[:, c:c + 1] * w1[c:c + 1, :]
    else:
        # bf16 operands, f32 accumulation.
        h = jnp.dot(x, w1_ref[...], preferred_element_type=jnp.float32)
    h = jnp.maximum(h + sh1_ref[...], 0.0)                 # (rows, C1)

    h = jnp.dot(h.astype(jnp.bfloat16), w2_ref[...],
                preferred_element_type=jnp.float32)
    h = jnp.maximum(h + sh2_ref[...], 0.0)                 # (rows, C2)

    h = jnp.dot(h.astype(jnp.bfloat16), w3_ref[...],
                preferred_element_type=jnp.float32)
    h = h + sh3_ref[...]                                   # (rows, C3)

    # Segmented max over this step's TN points of each cloud, folded into the
    # running per-cloud maximum.
    tile_max = jnp.max(h.reshape(tb, tn, h.shape[-1]), axis=1)   # (tb, C3)
    acc_ref[...] = jnp.maximum(acc_ref[...], tile_max)

    @pl.when(n == pl.num_programs(1) - 1)
    def _finish():
        out_ref[...] = acc_ref[...]


def pointnet_feat(x, params, *, rows_per_step=512):
    """x: (B, N, C_in) float32.  Returns (B, 1024) float32."""
    B, N, Cin = x.shape
    w1, s1, w2, s2, w3, s3 = params
    C1, C2, C3 = w1.shape[1], w2.shape[1], w3.shape[1]
    cin_small = Cin <= 8

    # Batch grouping: dense (TB, 1024) output stores; TB=8 when B allows.
    tb = 8 if B >= 8 else B
    B_pad = _round_up(B, tb)

    # Points tile so TB*TN rows ~= rows_per_step fill the MXU M dimension.
    tn = max(8, _round_up(max(1, rows_per_step // tb), 8))
    tn = min(tn, _round_up(N, 8))
    N_pad = _round_up(N, tn)

    # Pad batch with copies of cloud 0 (sliced off below); pad points with
    # copies of each cloud's first point (max over duplicates is unchanged,
    # so the result is exactly correct -- zero padding would NOT be).
    if B_pad > B:
        x = jnp.concatenate(
            [x, jnp.broadcast_to(x[:1], (B_pad - B, N, Cin))], axis=0)
    if N_pad > N:
        x = jnp.concatenate(
            [x, jnp.broadcast_to(x[:, :1], (B_pad, N_pad - N, Cin))], axis=1)

    # dtype plumbing: bf16 MXU operands (halves DMA), f32 everywhere else.
    if cin_small:
        x_in, w1_in = x, w1                      # conv1 runs on the VPU in f32
    else:
        x_in, w1_in = x.astype(jnp.bfloat16), w1.astype(jnp.bfloat16)
    w2_in = w2.astype(jnp.bfloat16)
    w3_in = w3.astype(jnp.bfloat16)
    s1_in = s1.reshape(1, C1)
    s2_in = s2.reshape(1, C2)
    s3_in = s3.reshape(1, C3)

    grid = (B_pad // tb, N_pad // tn)
    const2d = lambda b, n: (0, 0)

    out = pl.pallas_call(
        functools.partial(_pointnet_kernel, cin_small=cin_small),
        out_shape=jax.ShapeDtypeStruct((B_pad, C3), jnp.float32),
        grid_spec=pltpu.PrefetchScalarGridSpec(
            num_scalar_prefetch=0,
            grid=grid,
            in_specs=[
                pl.BlockSpec((tb, tn, Cin), lambda b, n: (b, n, 0)),
                pl.BlockSpec(w1_in.shape, const2d),
                pl.BlockSpec(s1_in.shape, const2d),
                pl.BlockSpec(w2_in.shape, const2d),
                pl.BlockSpec(s2_in.shape, const2d),
                pl.BlockSpec(w3_in.shape, const2d),
                pl.BlockSpec(s3_in.shape, const2d),
            ],
            out_specs=pl.BlockSpec((tb, C3), lambda b, n: (b, 0)),
            scratch_shapes=[pltpu.VMEM((tb, C3), jnp.float32)],
        ),
        compiler_params=pltpu.CompilerParams(
            dimension_semantics=("parallel", "arbitrary"),
            vmem_limit_bytes=32 * 1024 * 1024),
    )(x_in, w1_in, s1_in, w2_in, s2_in, w3_in, s3_in)

    return out[:B]


def make_params(key, inc):
    """Synthetic parameters matching PointNetfeat(inc), with BN (eval mode)
    pre-folded: per layer we return (w_folded = w * bn_scale, shift)."""
    if inc == 3:
        ch_seq = [64, 128, 1024]
    else:
        ch_seq = [max(inc, 256), 512, 1024]

    eps = 1e-5
    params = []
    ci = inc
    for co in ch_seq:
        key, kw, kb, kg, kbe, km, kv = jax.random.split(key, 7)
        w = jax.random.normal(kw, (ci, co), jnp.float32) * 0.05
        conv_b = jax.random.normal(kb, (co,), jnp.float32) * 0.05
        gamma = 1.0 + 0.1 * jax.random.normal(kg, (co,), jnp.float32)
        beta = 0.1 * jax.random.normal(kbe, (co,), jnp.float32)
        r_mean = 0.1 * jax.random.normal(km, (co,), jnp.float32)
        r_var = jnp.abs(jax.random.normal(kv, (co,), jnp.float32)) + 0.5
        scale = gamma * jax.lax.rsqrt(r_var + eps)
        w_folded = w * scale[None, :]                      # exact f32 fold
        shift = (conv_b - r_mean) * scale + beta
        params += [w_folded, shift]
        ci = co
    return tuple(params)


def pointnet_feat_ref(x, params):
    """Pure-JAX reference mirroring the kernel's dtype choices."""
    w1, s1, w2, s2, w3, s3 = params
    cin = x.shape[-1]
    if cin <= 8:
        h = jnp.einsum('bnc,cd->bnd', x, w1)
    else:
        h = jnp.einsum('bnc,cd->bnd', x.astype(jnp.bfloat16),
                       w1.astype(jnp.bfloat16),
                       preferred_element_type=jnp.float32)
    h = jnp.maximum(h + s1, 0.0)
    h = jnp.einsum('bnc,cd->bnd', h.astype(jnp.bfloat16),
                   w2.astype(jnp.bfloat16),
                   preferred_element_type=jnp.float32)
    h = jnp.maximum(h + s2, 0.0)
    h = jnp.einsum('bnc,cd->bnd', h.astype(jnp.bfloat16),
                   w3.astype(jnp.bfloat16),
                   preferred_element_type=jnp.float32)
    h = h + s3
    return jnp.max(h, axis=1)


if __name__ == "__main__":
    key = jax.random.PRNGKey(0)
    k1, k2, k3, k4 = jax.random.split(key, 4)

    # Test 1: inc=3 (point clouds) -> VPU conv1 path; N not a tile multiple
    # so the replicated-point padding and multi-step running max are exercised.
    B, N, inc = 2, 72, 3
    x = jax.random.normal(k1, (B, N, inc), jnp.float32)
    params = make_params(k2, inc)
    out = jax.block_until_ready(pointnet_feat(x, params, rows_per_step=64))
    ref = pointnet_feat_ref(x, params)
    assert out.shape == (B, 1024)
    assert jnp.allclose(out, ref, atol=1e-2, rtol=1e-2), \
        float(jnp.max(jnp.abs(out - ref)))

    # Test 2: inc=16 -> ch_seq [256, 512, 1024], bf16 MXU conv1 path.
    B2, N2, inc2 = 2, 40, 16
    x2 = jax.random.normal(k3, (B2, N2, inc2), jnp.float32)
    params2 = make_params(k4, inc2)
    out2 = jax.block_until_ready(pointnet_feat(x2, params2, rows_per_step=32))
    ref2 = pointnet_feat_ref(x2, params2)
    assert out2.shape == (B2, 1024)
    assert jnp.allclose(out2, ref2, atol=1e-2, rtol=1e-2), \
        float(jnp.max(jnp.abs(out2 - ref2)))

    print("KERNEL_OK")
</pallas_src>

<mosaic_0001>
module attributes {stable_mosaic.version = 11 : i64} {
  func.func @_pointnet_kernel(%arg0: i32, %arg1: i32, %arg2: memref<2x32x3xf32, #tpu.memory_space<vmem>>, %arg3: memref<3x64xf32, #tpu.memory_space<vmem>>, %arg4: memref<1x64xf32, #tpu.memory_space<vmem>>, %arg5: memref<64x128xbf16, #tpu.memory_space<vmem>>, %arg6: memref<1x128xf32, #tpu.memory_space<vmem>>, %arg7: memref<128x1024xbf16, #tpu.memory_space<vmem>>, %arg8: memref<1x1024xf32, #tpu.memory_space<vmem>>, %arg9: memref<2x1024xf32, #tpu.memory_space<vmem>>, %arg10: memref<2x1024xf32, #tpu.memory_space<vmem>>) attributes {dimension_semantics = [#tpu.dimension_semantics<parallel>, #tpu.dimension_semantics<arbitrary>], iteration_bounds = array<i64: 1, 3>, scalar_prefetch = 0 : i64, scratch_operands = 1 : i64, tpu.core_type = #tpu.core_type<tc>, window_params = [{transform_indices = @transform_0, window_bounds = array<i64: 2, 32, 3>}, {pipeline_mode = #tpu.pipeline_mode<synchronous>, transform_indices = @transform_1, window_bounds = array<i64: 3, 64>}, {pipeline_mode = #tpu.pipeline_mode<synchronous>, transform_indices = @transform_2, window_bounds = array<i64: 1, 64>}, {pipeline_mode = #tpu.pipeline_mode<synchronous>, transform_indices = @transform_3, window_bounds = array<i64: 64, 128>}, {pipeline_mode = #tpu.pipeline_mode<synchronous>, transform_indices = @transform_4, window_bounds = array<i64: 1, 128>}, {pipeline_mode = #tpu.pipeline_mode<synchronous>, transform_indices = @transform_5, window_bounds = array<i64: 128, 1024>}, {pipeline_mode = #tpu.pipeline_mode<synchronous>, transform_indices = @transform_6, window_bounds = array<i64: 1, 1024>}, {transform_indices = @transform_7, window_bounds = array<i64: 2, 1024>}]} {
    %c0_i32 = arith.constant 0 : i32
    %0 = arith.cmpi eq, %arg1, %c0_i32 : i32
    %1 = arith.extui %0 : i1 to i32
    %c0_i32_0 = arith.constant 0 : i32
    %2 = arith.cmpi ne, %1, %c0_i32_0 : i32
    scf.if %2 {
      %cst_24 = arith.constant 0xFF800000 : f32
      %50 = vector.broadcast %cst_24 : f32 to vector<2x1024xf32>
      %c0_25 = arith.constant 0 : index
      %c0_26 = arith.constant 0 : index
      %51 = vector.load %arg10[%c0_25, %c0_26] : memref<2x1024xf32, #tpu.memory_space<vmem>>, vector<2x1024xf32>
      tpu.vector_store %arg10[%c0_25, %c0_26], %50 {strides = array<i32>} : memref<2x1024xf32, #tpu.memory_space<vmem>>, vector<2x1024xf32>,
    } else {
    }
    %c0 = arith.constant 0 : index
    %c0_1 = arith.constant 0 : index
    %c0_2 = arith.constant 0 : index
    %3 = vector.load %arg2[%c0, %c0_1, %c0_2] : memref<2x32x3xf32, #tpu.memory_space<vmem>>, vector<2x32x3xf32>
    %4 = vector.shape_cast %3 : vector<2x32x3xf32> to vector<64x3xf32>
    %c0_3 = arith.constant 0 : index
    %c0_4 = arith.constant 0 : index
    %5 = vector.load %arg3[%c0_3, %c0_4] : memref<3x64xf32, #tpu.memory_space<vmem>>, vector<3x64xf32>
    %6 = vector.extract_strided_slice %4 {offsets = [0, 0], sizes = [64, 1], strides = [1, 1]} : vector<64x3xf32> to vector<64x1xf32>
    %7 = vector.extract_strided_slice %5 {offsets = [0, 0], sizes = [1, 64], strides = [1, 1]} : vector<3x64xf32> to vector<1x64xf32>
    %8 = vector.broadcast %6 : vector<64x1xf32> to vector<64x64xf32>
    %9 = vector.broadcast %7 : vector<1x64xf32> to vector<64x64xf32>
    %10 = arith.mulf %8, %9 : vector<64x64xf32>
    %11 = vector.extract_strided_slice %4 {offsets = [0, 1], sizes = [64, 1], strides = [1, 1]} : vector<64x3xf32> to vector<64x1xf32>
    %12 = vector.extract_strided_slice %5 {offsets = [1, 0], sizes = [1, 64], strides = [1, 1]} : vector<3x64xf32> to vector<1x64xf32>
    %13 = vector.broadcast %11 : vector<64x1xf32> to vector<64x64xf32>
    %14 = vector.broadcast %12 : vector<1x64xf32> to vector<64x64xf32>
    %15 = arith.mulf %13, %14 : vector<64x64xf32>
    %16 = arith.addf %10, %15 : vector<64x64xf32>
    %17 = vector.extract_strided_slice %4 {offsets = [0, 2], sizes = [64, 1], strides = [1, 1]} : vector<64x3xf32> to vector<64x1xf32>
    %18 = vector.extract_strided_slice %5 {offsets = [2, 0], sizes = [1, 64], strides = [1, 1]} : vector<3x64xf32> to vector<1x64xf32>
    %19 = vector.broadcast %17 : vector<64x1xf32> to vector<64x64xf32>
    %20 = vector.broadcast %18 : vector<1x64xf32> to vector<64x64xf32>
    %21 = arith.mulf %19, %20 : vector<64x64xf32>
    %22 = arith.addf %16, %21 : vector<64x64xf32>
    %c0_5 = arith.constant 0 : index
    %c0_6 = arith.constant 0 : index
    %23 = vector.load %arg4[%c0_5, %c0_6] : memref<1x64xf32, #tpu.memory_space<vmem>>, vector<1x64xf32>
    %24 = vector.broadcast %23 : vector<1x64xf32> to vector<64x64xf32>
    %25 = arith.addf %22, %24 : vector<64x64xf32>
    %cst = arith.constant 0.000000e+00 : f32
    %26 = vector.broadcast %cst : f32 to vector<64x64xf32>
    %27 = arith.maximumf %25, %26 : vector<64x64xf32>
    %28 = arith.truncf %27 : vector<64x64xf32> to vector<64x64xbf16>
    %c0_7 = arith.constant 0 : index
    %c0_8 = arith.constant 0 : index
    %29 = vector.load %arg5[%c0_7, %c0_8] : memref<64x128xbf16, #tpu.memory_space<vmem>>, vector<64x128xbf16>
    %cst_9 = arith.constant dense<0.000000e+00> : vector<64x128xf32>
    %30 = tpu.matmul %28, %29, %cst_9 {dimension_numbers = #tpu.dot_dimension_numbers<[1], [0], [0], [1], [0, 0, 1, 1], [], []>} : vector<64x64xbf16>, vector<64x128xbf16>, vector<64x128xf32> -> vector<64x128xf32>
    %c0_10 = arith.constant 0 : index
    %c0_11 = arith.constant 0 : index
    %31 = vector.load %arg6[%c0_10, %c0_11] : memref<1x128xf32, #tpu.memory_space<vmem>>, vector<1x128xf32>
    %32 = vector.broadcast %31 : vector<1x128xf32> to vector<64x128xf32>
    %33 = arith.addf %30, %32 : vector<64x128xf32>
    %cst_12 = arith.constant 0.000000e+00 : f32
    %34 = vector.broadcast %cst_12 : f32 to vector<64x128xf32>
    %35 = arith.maximumf %33, %34 : vector<64x128xf32>
    %36 = arith.truncf %35 : vector<64x128xf32> to vector<64x128xbf16>
    %c0_13 = arith.constant 0 : index
    %c0_14 = arith.constant 0 : index
    %37 = vector.load %arg7[%c0_13, %c0_14] : memref<128x1024xbf16, #tpu.memory_space<vmem>>, vector<128x1024xbf16>
    %cst_15 = arith.constant dense<0.000000e+00> : vector<64x1024xf32>
    %38 = tpu.matmul %36, %37, %cst_15 {dimension_numbers = #tpu.dot_dimension_numbers<[1], [0], [0], [1], [0, 0, 1, 1], [], []>} : vector<64x128xbf16>, vector<128x1024xbf16>, vector<64x1024xf32> -> vector<64x1024xf32>
    %c0_16 = arith.constant 0 : index
    %c0_17 = arith.constant 0 : index
    %39 = vector.load %arg8[%c0_16, %c0_17] : memref<1x1024xf32, #tpu.memory_space<vmem>>, vector<1x1024xf32>
    %40 = vector.broadcast %39 : vector<1x1024xf32> to vector<64x1024xf32>
    %41 = arith.addf %38, %40 : vector<64x1024xf32>
    %42 = vector.shape_cast %41 : vector<64x1024xf32> to vector<2x32x1024xf32>
    %cst_18 = arith.constant dense<0xFF800000> : vector<2x1024xf32>
    %43 = vector.multi_reduction <maximumf>, %42, %cst_18 [1] : vector<2x32x1024xf32> to vector<2x1024xf32>
    %c0_19 = arith.constant 0 : index
    %c0_20 = arith.constant 0 : index
    %44 = vector.load %arg10[%c0_19, %c0_20] : memref<2x1024xf32, #tpu.memory_space<vmem>>, vector<2x1024xf32>
    %45 = arith.maximumf %44, %43 : vector<2x1024xf32>
    %c0_21 = arith.constant 0 : index
    %c0_22 = arith.constant 0 : index
    %46 = vector.load %arg10[%c0_21, %c0_22] : memref<2x1024xf32, #tpu.memory_space<vmem>>, vector<2x1024xf32>
    tpu.vector_store %arg10[%c0_21, %c0_22], %45 {strides = array<i32>} : memref<2x1024xf32, #tpu.memory_space<vmem>>, vector<2x1024xf32>,
    %c2_i32 = arith.constant 2 : i32
    %47 = arith.cmpi eq, %arg1, %c2_i32 : i32
    %48 = arith.extui %47 : i1 to i32
    %c0_i32_23 = arith.constant 0 : i32
    %49 = arith.cmpi ne, %48, %c0_i32_23 : i32
    scf.if %49 {
      %c0_24 = arith.constant 0 : index
      %c0_25 = arith.constant 0 : index
      %50 = vector.load %arg10[%c0_24, %c0_25] : memref<2x1024xf32, #tpu.memory_space<vmem>>, vector<2x1024xf32>
      %c0_26 = arith.constant 0 : index
      %c0_27 = arith.constant 0 : index
      %51 = vector.load %arg9[%c0_26, %c0_27] : memref<2x1024xf32, #tpu.memory_space<vmem>>, vector<2x1024xf32>
      tpu.vector_store %arg9[%c0_26, %c0_27], %50 {strides = array<i32>} : memref<2x1024xf32, #tpu.memory_space<vmem>>, vector<2x1024xf32>,
    } else {
    }
    return
  }
  func.func @transform_0(%arg0: i32, %arg1: i32) -> (i32, i32, i32) {
    %c0_i32 = arith.constant 0 : i32
    %c0_i32_0 = arith.constant 0 : i32
    return %arg0, %arg1, %c0_i32 : i32, i32, i32
  }
  func.func @transform_1(%arg0: i32, %arg1: i32) -> (i32, i32) {
    %c0_i32 = arith.constant 0 : i32
    %c0_i32_0 = arith.constant 0 : i32
    %c0_i32_1 = arith.constant 0 : i32
    return %c0_i32, %c0_i32_0 : i32, i32
  }
  func.func @transform_2(%arg0: i32, %arg1: i32) -> (i32, i32) {
    %c0_i32 = arith.constant 0 : i32
    %c0_i32_0 = arith.constant 0 : i32
    %c0_i32_1 = arith.constant 0 : i32
    return %c0_i32, %c0_i32_0 : i32, i32
  }
  func.func @transform_3(%arg0: i32, %arg1: i32) -> (i32, i32) {
    %c0_i32 = arith.constant 0 : i32
    %c0_i32_0 = arith.constant 0 : i32
    %c0_i32_1 = arith.constant 0 : i32
    return %c0_i32, %c0_i32_0 : i32, i32
  }
  func.func @transform_4(%arg0: i32, %arg1: i32) -> (i32, i32) {
    %c0_i32 = arith.constant 0 : i32
    %c0_i32_0 = arith.constant 0 : i32
    %c0_i32_1 = arith.constant 0 : i32
    return %c0_i32, %c0_i32_0 : i32, i32
  }
  func.func @transform_5(%arg0: i32, %arg1: i32) -> (i32, i32) {
    %c0_i32 = arith.constant 0 : i32
    %c0_i32_0 = arith.constant 0 : i32
    %c0_i32_1 = arith.constant 0 : i32
    return %c0_i32, %c0_i32_0 : i32, i32
  }
  func.func @transform_6(%arg0: i32, %arg1: i32) -> (i32, i32) {
    %c0_i32 = arith.constant 0 : i32
    %c0_i32_0 = arith.constant 0 : i32
    %c0_i32_1 = arith.constant 0 : i32
    return %c0_i32, %c0_i32_0 : i32, i32
  }
  func.func @transform_7(%arg0: i32, %arg1: i32) -> (i32, i32) {
    %c0_i32 = arith.constant 0 : i32
    %c0_i32_0 = arith.constant 0 : i32
    return %arg0, %c0_i32 : i32, i32
  }
}

</mosaic_0001>

<bundles_post_ra>
// kernel: tpu_custom_call.1
= control target key start
LH: loop header
LB: loop body
LE: loop exit
PB: predicated region body
PF: predicated region fallthrough
CT: control target
= control target key end

     0   :  { %12 = vsyncpa [#allocation5], 0  ;;  %s2496_s0 = inlined_call_operand.vmem [shape: f32[2,96,3], index: 0, kind: input, shape index: {}]   ;;  %s2497_s1 = inlined_call_operand.vmem [shape: f32[3,64], index: 1, kind: input, shape index: {}]   ;;  %s2498_s2 = inlined_call_operand.vmem [shape: f32[1,64], index: 2, kind: input, shape index: {}]   ;;  %s2499_s3 = inlined_call_operand.vmem [shape: bf16[64,128], index: 3, kind: input, shape index: {}]   ;;  %s2500_s4 = inlined_call_operand.vmem [shape: f32[1,128], index: 4, kind: input, shape index: {}]   ;;  %s2501_s5 = inlined_call_operand.hbm [shape: bf16[128,1024], index: 5, kind: input, shape index: {}]   ;;  %s2502_s6 = inlined_call_operand.vmem [shape: f32[1,1024], index: 6, kind: input, shape index: {}]   ;;  %s2503_s7 = inlined_call_operand.hbm [shape: f32[2,1024], index: 7, kind: output, shape index: {}]  }
   0x1   :  { %13 = vsyncpa [#allocation6], 0  ;;  %s2190_s24 = smov 0   ;;  %s2192_s25 = smov 0  }
   0x2   :  { %s2194_s26 = smov 0   ;;  %s2196_s27 = smov 0  }
   0x3   :  { %s2198_s28 = smov 0  }
   0x4 LB: > { %s1587_s29 = sadd.s32 4294967295, %s2140_s28   ;;  %s28_s30 = sadd.s32 1, %s2136_s27  ;;  %s2140_s28 = sphi %s2198_s28, %s19_s28   ;;  %s2136_s27 = sphi %s2196_s27, %s2510_s27   ;;  %s2132_s26 = sphi %s2194_s26, %s2509_s26   ;;  %s2128_s25 = sphi %s2192_s25, %s2508_s25   ;;  %s2124_s24 = sphi %s2190_s24, %s2507_s24  }
   0x5   : > { %p29_p0 = scmp.ge.s32.totalorder %s28_s30, 3  ;;  %s40_s8 = sadd.s32 1, %s2128_s25 }
   0x6   : > { %p47_p1 = scmp.ne.s32.totalorder %s2128_s25, %s2124_s24  ;;  %p48_p2 = scmp.eq.s32.totalorder %s2140_s28, 0 }
   0x7   : > { %s2512_s30 = smov (%p29_p0, %s28_s30), 0  ;;  %p1588_p4 = scmp.ge.s32.totalorder %s2140_s28, 1 }
   0x8   : > { %p2223_p3 = por %p48_p2, %p47_p1  ;;  %s36_s10 = ssub.s32 %s2136_s27, %s2512_s30 }
   0x9   : > { %p216_p5 = scmp.lt.s32.totalorder %s2140_s28, 4  ;;  %p38_p6 = scmp.eq.s32.totalorder %s36_s10, 0 }
   0xa   : > { %p2237_p8 = scmp.eq.s32.totalorder %s1587_s29, 0  ;;  %s239_s16 = sshll.u32 %s2501_s5, 4  ;;  %s240_s16 = int_to_ptr.hbm [resolvable:$true] %s239_s16 }
   0xb   : > { %p2231_p7 = pnand %p1588_p4, %p216_p5  ;;  %s2142_s17 = smov [#allocation4]  }
   0xc   : > { %s2242_s13 = scalar_select %p38_p6, %s2128_s25, %s40_s8  }
   0xd   : > { %p1960_p9 = pneg %p2231_p7  ;;  %s241_s18 = sshll.u32 %s2142_s17, 4  ;;  %s242_s18 = int_to_ptr.vmem [resolvable:$true] %s241_s18 }
   0xe   : > { %s2143_s19 = smov 512   ;;  %s2144_s20 = smov 32  }
   0xf   : > { %p1961_p10 = pnand %p2237_p8, %p1960_p9  ;;  %p1590_p11 = scmp.ge.s32.totalorder %s2140_s28, 3 }
  0x11   : > { %1963 = dma.hbm_to_vmem [thread:$0]  (!%p1961_p10), %s240_s16, 8192, %s242_s18, [#allocation5], %s2143_s19, %s2143_s19, %s2144_s20  }
  0x12   : > { %254 = sbr.rel (%p1590_p11) target bundleno = 35 (0x23), region = 40 }
  0x17   : > { %257 = sbr.rel (!%p2223_p3) target bundleno = 35 (0x23), region = 44  ;;  %s259_s21 = sand.u32 (%p2223_p3), 1, %s2128_s25  }
  0x18   : > { %s1879_s22 = sshll.u32 (%p2223_p3), %s2136_s27, 5  ;;  %s1591_s23 = sshll.u32 (%p2223_p3), %s259_s21, 6 }
  0x19   : > { %s267_s14 = scalar_lea.vmem (%p2223_p3), %s2496_s0, %s1879_s22  ;;  %s261_s15 = scalar_lea.vmem (%p2223_p3), [#allocation3], %s1591_s23 }
  0x1a   : > { %v310_v0 = vld [vmem:[%s267_s14] sm:$0xff] (%p2223_p3)  ;;  %v312_v1 = vld [vmem:[%s267_s14 + $0x8] sm:$0xff] (%p2223_p3)  ;;  %v314_v2 = vld [vmem:[%s267_s14 + $0x10] sm:$0xff] (%p2223_p3) }
  0x1b   : > { %311 = vst [vmem:[%s261_s15] sm:$0xff] (%p2223_p3), %v310_v0  ;;  %v316_v3 = vld [vmem:[%s267_s14 + $0x18] sm:$0xff] (%p2223_p3)  ;;  %v318_v4 = vld [vmem:[%s267_s14 + $0x60] sm:$0xff] (%p2223_p3)  ;;  %v320_v5 = vld [vmem:[%s267_s14 + $0x68] sm:$0xff] (%p2223_p3) }
  0x1c   : > { %313 = vst [vmem:[%s261_s15 + $0x8] sm:$0xff] %v312_v1  ;;  %v322_v6 = vld [vmem:[%s267_s14 + $0x70] sm:$0xff]  ;;  %v324_v7 = vld [vmem:[%s267_s14 + $0x78] sm:$0xff] }
  0x1d   : > { %315 = vst [vmem:[%s261_s15 + $0x10] sm:$0xff] %v314_v2 }
  0x1e   : > { %317 = vst [vmem:[%s261_s15 + $0x18] sm:$0xff] %v316_v3 }
  0x1f   : > { %319 = vst [vmem:[%s261_s15 + $0x20] sm:$0xff] %v318_v4 }
  0x20   : > { %321 = vst [vmem:[%s261_s15 + $0x28] sm:$0xff] %v320_v5 }
  0x21   : > { %323 = vst [vmem:[%s261_s15 + $0x30] sm:$0xff] %v322_v6 }
  0x22   : > { %325 = vst [vmem:[%s261_s15 + $0x38] sm:$0xff] %v324_v7 }
  0x23 PF: > { %334 = sbr.rel (%p2231_p7) target bundleno = 637 (0x27d), region = 82  ;;  %s337_s9 = sand.u32 (!%p2231_p7), 1, %s2124_s24  }
  0x24   : > { %s1595_s16 = sshll.u32 (!%p2231_p7), %s337_s9, 6 }
  0x25   : > { %s2262_s17 = scalar_lea.vmem (!%p2231_p7), [#allocation3], %s1595_s16 }
  0x28   : > { %2115 = dma.done.wait (%p2237_p8), [#allocation5], 8192  }
  0x29   : > { %2117 = vsyncadd (%p2237_p8), [#allocation5], 4294959104  ;;  %p1597_p12 = scmp.ne.s32.totalorder %s2132_s26, 0 }
  0x2b   : > { %374 = sbr.rel (%p1597_p12) target bundleno = 51 (0x33), region = 94 }
  0x30   : > { %v2145_v8 = vmov -inf  }
  0x31   : > { %375 = vst [vmem:[#allocation2] sm:$0xff] %v2145_v8 }
  0x32   : > { %376 = vst [vmem:[#allocation2 + $0x8] sm:$0xff] %v2145_v8 }
  0x33 PF: > { %v377_v9 = vld [vmem:[%s2262_s17] sm:$0xff]  ;;  %v2146_v10 = vmov 1   ;;  %v2147_v11 = vmov 0   ;;  %v2148_v12 = vmov 2   ;;  %v378_v13 = vld [vmem:[%s2262_s17 + $0x8] sm:$0xff]  ;;  %v379_v14 = vld [vmem:[%s2262_s17 + $0x10] sm:$0xff] }
  0x34   : > { %2017 = vset.pattern.permute.xlu1 %v2146_v10  ;;  %2016 = vset.pattern.permute.xlu0 %v2147_v11  ;;  %v380_v15 = vld [vmem:[%s2262_s17 + $0x18] sm:$0xff]  ;;  %v381_v16 = vld [vmem:[%s2262_s17 + $0x20] sm:$0xff]  ;;  %v382_v17 = vld [vmem:[%s2262_s17 + $0x28] sm:$0xff]  ;;  %vm593_vm0 = vcmask 523264   ;;  %vm1455_vm1 = vcmask 1041408   ;;  %vm1457_vm2 = vcmask 1045508  }
  0x35   : > { %436 = vperm.xlu1 %2017, %v377_v9   ;;  %388 = vperm.xlu0 %2016, %v377_v9   ;;  %v383_v18 = vld [vmem:[%s2262_s17 + $0x30] sm:$0xff]  ;;  %v384_v19 = vld [vmem:[%s2262_s17 + $0x38] sm:$0xff]  ;;  %v1883_v20 = vld [vmem:[%s2499_s3 + $0x18] sm:$0xff]  ;;  %vm1459_vm3 = vcmask 1043456   ;;  %vm1475_vm4 = vcmask 1041409   ;;  %vm1477_vm5 = vcmask 1043459  }
  0x36   : > { %2018 = vset.pattern.permute.xlu2 %v2148_v12  ;;  %610 = vmatpush.bf16.msra.mxu0 %v1883_v20  ;;  %v1882_v21 = vld [vmem:[%s2499_s3 + $0x10] sm:$0xff]  ;;  %v1881_v22 = vld [vmem:[%s2499_s3 + $0x8] sm:$0xff]  ;;  %v1880_v23 = vld [vmem:[%s2499_s3] sm:$0xff]  ;;  %vm1479_vm6 = vcmask 1045509   ;;  %vm1481_vm7 = vcmask 1047559   ;;  %p1874_p13 = scmp.ne.s32.totalorder %s2132_s26, 2 }
  0x37   : > { %485 = vperm.xlu2 %2018, %v377_v9   ;;  %1948 = vmatpush.bf16.msra.mxu1 %v1883_v20  ;;  %v385_v25 = vld [vmem:[%s2497_s1] sm:$0x7] }
  0x38   : > { %v2292_v26 = vperm.slane %v385_v25, 1  ;;  %v2294_v27 = vperm.slane %v385_v25, 0  ;;  %v2296_v31 = vperm.slane %v385_v25, 2  ;;  %v2306_v42 = vld [vmem:[%s2498_s2] ss:$0 sm:$0xff] }
  0x39   : > { %v1944_v25 = vld [vmem:[#allocation4 + $0x1dc] sm:$0xf0] }
  0x3a   : > { %611 = vmatpush.bf16.msra.mxu0 %v1882_v21 }
  0x3b   : > { %1949 = vmatpush.bf16.msra.mxu1 %v1882_v21 }
  0x3d   : > { %440 = vperm.xlu1 %2017, %v378_v13   ;;  %393 = vperm.xlu0 %2016, %v378_v13  }
  0x3e   : > { %612 = vmatpush.bf16.msra.mxu0 %v1881_v22 }
  0x3f   : > { %489 = vperm.xlu2 %2018, %v378_v13   ;;  %1950 = vmatpush.bf16.msra.mxu1 %v1881_v22 }
  0x42   : > { %613 = vmatpush.bf16.msra.mxu0 %v1880_v23 }
  0x43   : > { %1951 = vmatpush.bf16.msra.mxu1 %v1880_v23 }
  0x45   : > { %2019 = vset.pattern.permute.xlu1 %v2147_v11  ;;  %398 = vperm.xlu0 %2016, %v379_v14  }
  0x46   : > { %403 = vperm.xlu1 %2019, %v380_v15  }
  0x47   : > { %2020 = vset.pattern.permute.xlu2 %v2146_v10 }
  0x48   : > { %444 = vperm.xlu2 %2020, %v379_v14  }
  0x4d   : > { %2021 = vset.pattern.permute.xlu0 %v2146_v10 }
  0x4e   : > { %2022 = vset.pattern.permute.xlu1 %v2148_v12  ;;  %448 = vperm.xlu0 %2021, %v380_v15  }
  0x4f   : > { %493 = vperm.xlu1 %2022, %v379_v14  }
  0x50   : > { %2023 = vset.pattern.permute.xlu2 %v2148_v12 }
  0x51   : > { %497 = vperm.xlu2 %2023, %v380_v15  }
  0x56   : > { %452 = vperm.xlu0 %2021, %v381_v16  }
  0x57   : > { %2024 = vset.pattern.permute.xlu1 %v2147_v11 }
  0x58   : > { %408 = vperm.xlu1 %2024, %v381_v16  }
  0x59   : > { %2025 = vset.pattern.permute.xlu2 %v2147_v11 }
  0x5a   : > { %413 = vperm.xlu2 %2025, %v382_v17  }
  0x5e   : > { %2028 = vset.pattern.permute.xlu0 %v2148_v12 }
  0x5f   : > { %505 = vperm.xlu0 %2028, %v382_v17  }
  0x60   : > { %2026 = vset.pattern.permute.xlu1 %v2146_v10 }
  0x61   : > { %456 = vperm.xlu1 %2026, %v382_v17  }
  0x62   : > { %2027 = vset.pattern.permute.xlu2 %v2148_v12 }
  0x63   : > { %501 = vperm.xlu2 %2027, %v381_v16  }
  0x67   : > { %509 = vperm.xlu0 %2028, %v383_v18  }
  0x69   : > { %2029 = vset.pattern.permute.xlu1 %v2147_v11 }
  0x6a   : > { %418 = vperm.xlu1 %2029, %v383_v18  }
  0x6b   : > { %2030 = vset.pattern.permute.xlu2 %v2147_v11 }
  0x6c   : > { %423 = vperm.xlu2 %2030, %v384_v19  }
  0x72   : > { %2031 = vset.pattern.permute.xlu1 %v2146_v10 }
  0x73   : > { %460 = vperm.xlu1 %2031, %v383_v18  }
  0x74   : > { %2032 = vset.pattern.permute.xlu2 %v2146_v10 }
  0x75   : > { %464 = vperm.xlu2 %2032, %v384_v19  }
  0x7b   : > { %2033 = vset.pattern.permute.xlu1 %v2148_v12 }
  0x7c   : > { %513 = vperm.xlu1 %2033, %v384_v19  }
  0x91   : > { %v486_v24 = vpop.permute.xlu2 %485 }
  0x92   : > { %v517_v34 = vmul.f32 %v2296_v31, %v486_v24  ;;  %v1844_v24 = vld [vmem:[#allocation4 + $0x1c0] sm:$0xf] }
  0x99   : > { %v490_v28 = vpop.permute.xlu2 %489 }
  0x9a   : > { %v518_v43 = vmul.f32 %v2296_v31, %v490_v28  ;;  %v1940_v28 = vld [vmem:[#allocation4 + $0x1c4] sm:$0xf] }
  0xa2   : > { %v445_v36 = vpop.permute.xlu2 %444 }
  0xa3   : > { %v470_v54 = vmul.f32 %v2292_v26, %v445_v36 }
  0xa7   : > { %v437_v29 = vpop.permute.xlu1 %436  ;;  %v389_v30 = vpop.permute.xlu0 %388 }
  0xa8   : > { %v468_v32 = vmul.f32 %v2292_v26, %v437_v29  ;;  %v427_v33 = vmul.f32 %v2294_v27, %v389_v30  ;;  %v1845_v30 = vor.u32 %v1944_v25, %v1844_v24 }
  0xaa   : > { %v476_v35 = vadd.f32 %v468_v32, %v427_v33  ;;  %v1846_v32 = vld [vmem:[#allocation4 + $0x1e0] sm:$0xf0]  ;;  %v1852_v33 = vld [vmem:[#allocation4 + $0x1c8] sm:$0xf]  ;;  %1049 = vmatpush.bf16.msrb.mxu1 %v1845_v30 }
  0xab   : > { %v498_v52 = vpop.permute.xlu2 %497 }
  0xac   : > { %v525_v39 = vadd.f32 %v517_v34, %v476_v35  ;;  %v520_v58 = vmul.f32 %v2296_v31, %v498_v52  ;;  %v1945_v34 = vld [vmem:[#allocation4 + $0x1e4] sm:$0xf0]  ;;  %v1849_v35 = vor.u32 %v1940_v28, %v1846_v32 }
  0xad   : > { %v1853_v36 = vor.u32 %v1945_v34, %v1852_v33 }
  0xae   : > { %v537_v46 = vadd.f32 %v2306_v42, %v525_v39  ;;  %v1812_v39 = vld [vmem:[#allocation4 + $0x180] sm:$0xf]  ;;  %1078 = vmatpush.bf16.msra.mxu2 %v1849_v35 }
  0xaf   : > { %v441_v37 = vpop.permute.xlu1 %440  ;;  %v394_v38 = vpop.permute.xlu0 %393  ;;  %1107 = vmatpush.bf16.msra.mxu3 %v1853_v36 }
  0xb0   : > { %v469_v40 = vmul.f32 %v2292_v26, %v441_v37  ;;  %v428_v41 = vmul.f32 %v2294_v27, %v394_v38  ;;  %v545_v50 = vmax.f32 %v537_v46, 0.0  ;;  %v1941_v37 = vld [vmem:[#allocation4 + $0x1cc] sm:$0xf]  ;;  %v1932_v46 = vld [vmem:[#allocation4 + $0x184] sm:$0xf] }
  0xb1   : > { %v1854_v38 = vld [vmem:[#allocation4 + $0x1e8] sm:$0xf0] }
  0xb2   : > { %v477_v44 = vadd.f32 %v469_v40, %v428_v41 }
  0xb4   : > { %v526_v45 = vadd.f32 %v518_v43, %v477_v44  ;;  %v414_v0 = vpop.permute.xlu2 %413  ;;  %v1857_v44 = vor.u32 %v1941_v37, %v1854_v38 }
  0xb5   : > { %v432_v17 = vmul.f32 %v2294_v27, %v414_v0  ;;  %v1925_v0 = vld [vmem:[#allocation4 + $0x14c] sm:$0xf] }
  0xb6   : > { %v538_v47 = vadd.f32 %v2306_v42, %v526_v45  ;;  %v1936_v45 = vld [vmem:[#allocation4 + $0x19c] sm:$0xf0]  ;;  %1136 = vmatpush.bf16.msrb.mxu0 %v1857_v44  ;;  %v1724_v44 = vld [vmem:[#allocation4 + $0xc8] sm:$0xf] }
  0xb7   : > { %v399_v48 = vpop.permute.xlu0 %398 }
  0xb8   : > { %v404_v49 = vpop.permute.xlu1 %403  ;;  %v546_v51 = vmax.f32 %v538_v47, 0.0  ;;  %v429_v55 = vmul.f32 %v2294_v27, %v399_v48  ;;  %v1813_v47 = vor.u32 %v1936_v45, %v1812_v39  ;;  %v1814_v48 = vld [vmem:[#allocation4 + $0x1a0] sm:$0xf0]  ;;  %v1913_v45 = vld [vmem:[#allocation4 + $0xe4] sm:$0xf0] }
  0xb9   : > { %v430_v57 = vmul.f32 %v2294_v27, %v404_v49  ;;  %v1820_v49 = vld [vmem:[#allocation4 + $0x188] sm:$0xf] }
  0xba   : > { %v553_v53 = vpack.c.bf16 %v546_v51, %v545_v50  ;;  %v478_v61 = vadd.f32 %v470_v54, %v429_v55  ;;  %v1937_v50 = vld [vmem:[#allocation4 + $0x1a4] sm:$0xf0]  ;;  %v1933_v55 = vld [vmem:[#allocation4 + $0x18c] sm:$0xf]  ;;  %1050 = vmatpush.bf16.msrb.mxu1 %v1813_v47  ;;  %v1725_v47 = vor.u32 %v1913_v45, %v1724_v44 }
  0xbb   : > { %v1821_v54 = vor.u32 %v1937_v50, %v1820_v49  ;;  %v1904_v50 = vld [vmem:[#allocation4 + $0x9c] sm:$0xf0] }
  0xbc   : > { %1614 = vmatmul.msk.bf16.vlgmr.msra.gmra.mxu0 %vm593_vm0, %v553_v53  ;;  %v1817_v53 = vor.u32 %v1932_v46, %v1814_v48  ;;  %v1726_v48 = vld [vmem:[#allocation4 + $0xe8] sm:$0xf0] }
  0xbd   : > { %v502_v12 = vpop.permute.xlu2 %501  ;;  %1108 = vmatpush.bf16.msra.mxu3 %v1821_v54  ;;  %v1692_v54 = vld [vmem:[#allocation4 + $0x88] sm:$0xf] }
  0xbe   : > { %v521_v14 = vmul.f32 %v2296_v31, %v502_v12  ;;  %1079 = vmatpush.bf16.msra.mxu2 %v1817_v53  ;;  %v1917_v12 = vld [vmem:[#allocation4 + $0x10c] sm:$0xf]  ;;  %v1686_v53 = vld [vmem:[#allocation4 + $0xa0] sm:$0xf0] }
  0xc0   : > { %v449_v56 = vpop.permute.xlu0 %448 }
  0xc1   : > { %v471_v59 = vmul.f32 %v2292_v26, %v449_v56  ;;  %v494_v60 = vpop.permute.xlu1 %493  ;;  %v1822_v56 = vld [vmem:[#allocation4 + $0x1a8] sm:$0xf0] }
  0xc2   : > { %v519_v62 = vmul.f32 %v2296_v31, %v494_v60  ;;  %v1924_v60 = vld [vmem:[#allocation4 + $0x144] sm:$0xf] }
  0xc3   : > { %v479_v63 = vadd.f32 %v471_v59, %v430_v57  ;;  %v1780_v57 = vld [vmem:[#allocation4 + $0x140] sm:$0xf] }
  0xc4   : > { %v527_v1 = vadd.f32 %v519_v62, %v478_v61  ;;  %v1928_v59 = vld [vmem:[#allocation4 + $0x15c] sm:$0xf0]  ;;  %v1782_v61 = vld [vmem:[#allocation4 + $0x160] sm:$0xf0]  ;;  %v1788_v62 = vld [vmem:[#allocation4 + $0x148] sm:$0xf] }
  0xc5   : > { %v528_v2 = vadd.f32 %v520_v58, %v479_v63  ;;  %v1825_v58 = vor.u32 %v1933_v55, %v1822_v56  ;;  %v1929_v63 = vld [vmem:[#allocation4 + $0x164] sm:$0xf0] }
  0xc6   : > { %v539_v3 = vadd.f32 %v2306_v42, %v527_v1  ;;  %v424_v51 = vpop.permute.xlu2 %423  ;;  %v1781_v1 = vor.u32 %v1928_v59, %v1780_v57  ;;  %v1905_v55 = vld [vmem:[#allocation4 + $0xa4] sm:$0xf0]  ;;  %v1694_v59 = vld [vmem:[#allocation4 + $0xa8] sm:$0xf0] }
  0xc7   : > { %v540_v4 = vadd.f32 %v2306_v42, %v528_v2  ;;  %v1785_v2 = vor.u32 %v1924_v60, %v1782_v61  ;;  %1137 = vmatpush.bf16.msrb.mxu0 %v1825_v58  ;;  %v434_v24 = vmul.f32 %v2294_v27, %v424_v51  ;;  %v1900_v51 = vld [vmem:[#allocation4 + $0x84] sm:$0xf]  ;;  %v1693_v57 = vor.u32 %v1905_v55, %v1692_v54  ;;  %v1901_v58 = vld [vmem:[#allocation4 + $0x8c] sm:$0xf]  ;;  %v1652_v61 = vld [vmem:[#allocation4 + $0x40] sm:$0xf] }
  0xc8   : > { %v547_v5 = vmax.f32 %v539_v3, 0.0  ;;  %v453_v6 = vpop.permute.xlu0 %452  ;;  %v1790_v3 = vld [vmem:[#allocation4 + $0x168] sm:$0xf0]  ;;  %1051 = vmatpush.bf16.msrb.mxu1 %v1781_v1  ;;  %v1689_v56 = vor.u32 %v1900_v51, %v1686_v53  ;;  %v1697_v60 = vor.u32 %v1901_v58, %v1694_v59  ;;  %v1654_v1 = vld [vmem:[#allocation4 + $0x60] sm:$0xf0] }
  0xc9   : > { %v548_v7 = vmax.f32 %v540_v4, 0.0  ;;  %v472_v11 = vmul.f32 %v2292_v26, %v453_v6  ;;  %v1748_v4 = vld [vmem:[#allocation4 + $0x100] sm:$0xf]  ;;  %v1789_v6 = vor.u32 %v1929_v63, %v1788_v62  ;;  %1080 = vmatpush.bf16.msra.mxu2 %v1785_v2  ;;  %v1892_v63 = vld [vmem:[#allocation4 + $0x44] sm:$0xf] }
  0xca   : > { %v409_v8 = vpop.permute.xlu1 %408  ;;  %v1896_v62 = vld [vmem:[#allocation4 + $0x5c] sm:$0xf0]  ;;  %v1660_v2 = vld [vmem:[#allocation4 + $0x48] sm:$0xf]  ;;  %v1828_v51 = vld [vmem:[#allocation4 + $0x190] sm:$0xf] }
  0xcb   : > { %v554_v9 = vpack.c.bf16 %v548_v7, %v547_v5  ;;  %v431_v10 = vmul.f32 %v2294_v27, %v409_v8  ;;  %v1920_v5 = vld [vmem:[#allocation4 + $0x11c] sm:$0xf0]  ;;  %v1793_v7 = vor.u32 %v1925_v0, %v1790_v3  ;;  %v1916_v8 = vld [vmem:[#allocation4 + $0x104] sm:$0xf]  ;;  %1109 = vmatpush.bf16.msra.mxu3 %v1789_v6  ;;  %v1653_v0 = vor.u32 %v1896_v62, %v1652_v61  ;;  %v1897_v3 = vld [vmem:[#allocation4 + $0x64] sm:$0xf0] }
  0xcc   : > { %v1893_v6 = vld [vmem:[#allocation4 + $0x4c] sm:$0xf]  ;;  %v1926_v53 = vld [vmem:[#allocation4 + $0x154] sm:$0xf]  ;;  %v1806_v61 = vld [vmem:[#allocation4 + $0x178] sm:$0xf0] }
  0xcd   : > { %1615 = vmatmul.msk.bf16.gmra.mxu0 %vm593_vm0, %v554_v9  ;;  %v480_v13 = vadd.f32 %v472_v11, %v431_v10  ;;  %v1750_v9 = vld [vmem:[#allocation4 + $0x120] sm:$0xf0]  ;;  %v1756_v10 = vld [vmem:[#allocation4 + $0x108] sm:$0xf]  ;;  %v1798_v55 = vld [vmem:[#allocation4 + $0x170] sm:$0xf0] }
  0xce   : > { %v1921_v11 = vld [vmem:[#allocation4 + $0x124] sm:$0xf0]  ;;  %1138 = vmatpush.bf16.msrb.mxu0 %v1793_v7  ;;  %v1662_v7 = vld [vmem:[#allocation4 + $0x68] sm:$0xf0]  ;;  %v1801_v58 = vor.u32 %v1926_v53, %v1798_v55  ;;  %v1899_v53 = vld [vmem:[#allocation4 + $0x74] sm:$0xf0] }
  0xcf   : > { %v529_v18 = vadd.f32 %v521_v14, %v480_v13  ;;  %v1758_v13 = vld [vmem:[#allocation4 + $0x128] sm:$0xf0] }
  0xd1   : > { %v506_v15 = vpop.permute.xlu0 %505  ;;  %v541_v22 = vadd.f32 %v2306_v42, %v529_v18  ;;  %v1757_v18 = vor.u32 %v1921_v11, %v1756_v10  ;;  %v1888_v10 = vld [vmem:[#allocation4 + $0x1c] sm:$0xf0]  ;;  %v1884_v11 = vld [vmem:[#allocation4 + $0x4] sm:$0xf] }
  0xd2   : > { %v522_v20 = vmul.f32 %v2296_v31, %v506_v15  ;;  %v1749_v15 = vor.u32 %v1920_v5, %v1748_v4  ;;  %v1657_v4 = vor.u32 %v1892_v63, %v1654_v1  ;;  %v1661_v5 = vor.u32 %v1897_v3, %v1660_v2  ;;  %v1796_v63 = vld [vmem:[#allocation4 + $0x150] sm:$0xf]  ;;  %v1918_v2 = vld [vmem:[#allocation4 + $0x114] sm:$0xf] }
  0xd3   : > { %v457_v16 = vpop.permute.xlu1 %456  ;;  %v549_v40 = vmax.f32 %v541_v22, 0.0  ;;  %v465_v22 = vpop.permute.xlu2 %464  ;;  %1110 = vmatpush.bf16.msra.mxu3 %v1757_v18  ;;  %v1885_v18 = vld [vmem:[#allocation4 + $0xc] sm:$0xf]  ;;  %v1766_v3 = vld [vmem:[#allocation4 + $0x130] sm:$0xf0] }
  0xd4   : > { %v473_v19 = vmul.f32 %v2292_v26, %v457_v16  ;;  %v1753_v16 = vor.u32 %v1916_v8, %v1750_v9  ;;  %1052 = vmatpush.bf16.msrb.mxu1 %v1749_v15  ;;  %v475_v28 = vmul.f32 %v2292_v26, %v465_v22  ;;  %v1665_v8 = vor.u32 %v1893_v6, %v1662_v7  ;;  %v1620_v9 = vld [vmem:[#allocation4] sm:$0xf]  ;;  %v1889_v15 = vld [vmem:[#allocation4 + $0x24] sm:$0xf0]  ;;  %v1862_v22 = vld [vmem:[#allocation4 + $0x1f0] sm:$0xf0] }
  0xd5   : > { %v1923_v6 = vld [vmem:[#allocation4 + $0x134] sm:$0xf0]  ;;  %v1919_v7 = vld [vmem:[#allocation4 + $0x11c] sm:$0xf] }
  0xd6   : > { %v481_v21 = vadd.f32 %v473_v19, %v432_v17  ;;  %v1761_v19 = vor.u32 %v1917_v12, %v1758_v13  ;;  %1081 = vmatpush.bf16.msra.mxu2 %v1753_v16  ;;  %v483_v32 = vadd.f32 %v475_v28, %v434_v24  ;;  %v1621_v12 = vor.u32 %v1888_v10, %v1620_v9  ;;  %v1622_v13 = vld [vmem:[#allocation4 + $0x20] sm:$0xf0] }
  0xd7   : > { %1111 = vmatpush.bf16.msra.mxu3 %v1725_v47  ;;  %v1625_v16 = vor.u32 %v1884_v11, %v1622_v13  ;;  %v1838_v47 = vld [vmem:[#allocation4 + $0x1b8] sm:$0xf0]  ;;  %v1764_v11 = vld [vmem:[#allocation4 + $0x110] sm:$0xf]  ;;  %v1910_v13 = vld [vmem:[#allocation4 + $0xd4] sm:$0xf] }
  0xd8   : > { %v530_v23 = vadd.f32 %v522_v20, %v481_v21  ;;  %1139 = vmatpush.bf16.msrb.mxu0 %v1761_v19  ;;  %v1630_v19 = vld [vmem:[#allocation4 + $0x28] sm:$0xf0] }
  0xd9   : > { %v510_v21 = vpop.permute.xlu0 %509 }
  0xda   : > { %v542_v29 = vadd.f32 %v2306_v42, %v530_v23  ;;  %v523_v25 = vmul.f32 %v2296_v31, %v510_v21  ;;  %v1942_v21 = vld [vmem:[#allocation4 + $0x1d4] sm:$0xf] }
  0xdb   : > { %1112 = vmatpush.bf16.msra.mxu3 %v1693_v57  ;;  %v1865_v24 = vor.u32 %v1942_v21, %v1862_v22  ;;  %v1931_v57 = vld [vmem:[#allocation4 + $0x174] sm:$0xf0] }
  0xdc   : > { %v550_v41 = vmax.f32 %v542_v29, 0.0  ;;  %v419_v43 = vpop.permute.xlu1 %418 }
  0xdd   : > { %v433_v20 = vmul.f32 %v2294_v27, %v419_v43  ;;  %v1716_v27 = vld [vmem:[#allocation4 + $0xc0] sm:$0xf] }
  0xde   : > { %v555_v52 = vpack.c.bf16 %v550_v41, %v549_v40  ;;  %v1912_v40 = vld [vmem:[#allocation4 + $0xdc] sm:$0xf0]  ;;  %v1908_v41 = vld [vmem:[#allocation4 + $0xc4] sm:$0xf] }
  0xdf   : > { %v1717_v43 = vor.u32 %v1912_v40, %v1716_v27  ;;  %1113 = vmatpush.bf16.msra.mxu3 %v1661_v5  ;;  %v1830_v40 = vld [vmem:[#allocation4 + $0x1b0] sm:$0xf0]  ;;  %v1769_v5 = vor.u32 %v1918_v2, %v1766_v3  ;;  %v1644_v3 = vld [vmem:[#allocation4 + $0x18] sm:$0xf] }
  0xe0   : > { %1616 = vmatmul.msk.bf16.vlgmr.msra.gmra.mxu1 %vm593_vm0, %v555_v52  ;;  %v1638_v2 = vld [vmem:[#allocation4 + $0x30] sm:$0xf0] }
  0xe1   : > { %1053 = vmatpush.bf16.msrb.mxu1 %v1717_v43  ;;  %v1939_v43 = vld [vmem:[#allocation4 + $0x1b4] sm:$0xf0] }
  0xe5   : > { %v461_v14 = vpop.permute.xlu1 %460 }
  0xe6   : > { %v474_v17 = vmul.f32 %v2292_v26, %v461_v14  ;;  %v1718_v26 = vld [vmem:[#allocation4 + $0xe0] sm:$0xf0]  ;;  %v1628_v14 = vld [vmem:[#allocation4 + $0x8] sm:$0xf] }
  0xe7   : > { %v1721_v46 = vor.u32 %v1908_v41, %v1718_v26  ;;  %v1836_v41 = vld [vmem:[#allocation4 + $0x198] sm:$0xf] }
  0xe8   : > { %v482_v23 = vadd.f32 %v474_v17, %v433_v20  ;;  %v1629_v17 = vor.u32 %v1889_v15, %v1628_v14  ;;  %v1633_v20 = vor.u32 %v1885_v18, %v1630_v19  ;;  %v1837_v45 = vor.u32 %v1939_v43, %v1836_v41  ;;  %v1915_v18 = vld [vmem:[#allocation4 + $0xf4] sm:$0xf0]  ;;  %v1903_v43 = vld [vmem:[#allocation4 + $0x9c] sm:$0xf] }
  0xe9   : > { %1082 = vmatpush.bf16.msra.mxu2 %v1721_v46  ;;  %v1935_v46 = vld [vmem:[#allocation4 + $0x19c] sm:$0xf] }
  0xea   : > { %v531_v29 = vadd.f32 %v523_v25, %v482_v23  ;;  %1114 = vmatpush.bf16.msra.mxu3 %v1629_v17  ;;  %v1868_v23 = vld [vmem:[#allocation4 + $0x1d8] sm:$0xf] }
  0xeb   : > { %v1947_v25 = vld [vmem:[#allocation4 + $0x1f4] sm:$0xf0] }
  0xec   : > { %v543_v35 = vadd.f32 %v2306_v42, %v531_v29  ;;  %v1869_v29 = vor.u32 %v1947_v25, %v1868_v23  ;;  %v1740_v17 = vld [vmem:[#allocation4 + $0xd8] sm:$0xf] }
  0xed   : > { %1083 = vmatpush.bf16.msra.mxu2 %v1689_v56  ;;  %v1804_v56 = vld [vmem:[#allocation4 + $0x158] sm:$0xf]  ;;  %v1741_v21 = vor.u32 %v1915_v18, %v1740_v17 }
  0xee   : > { %v514_v30 = vpop.permute.xlu1 %513  ;;  %v551_v38 = vmax.f32 %v543_v35, 0.0  ;;  %1223 = vmatpush.bf16.msrb.mxu3 %v1869_v29  ;;  %v1805_v59 = vor.u32 %v1931_v57, %v1804_v56  ;;  %v1742_v29 = vld [vmem:[#allocation4 + $0xf8] sm:$0xf0] }
  0xef   : > { %v524_v33 = vmul.f32 %v2296_v31, %v514_v30  ;;  %v1909_v31 = vld [vmem:[#allocation4 + $0xcc] sm:$0xf]  ;;  %v1943_v30 = vld [vmem:[#allocation4 + $0x1dc] sm:$0xf] }
  0xf0   : > { %v1729_v49 = vor.u32 %v1909_v31, %v1726_v48  ;;  %v1841_v31 = vor.u32 %v1935_v46, %v1838_v47 }
  0xf1   : > { %v532_v34 = vadd.f32 %v524_v33, %v483_v32  ;;  %1084 = vmatpush.bf16.msra.mxu2 %v1657_v4  ;;  %v1870_v32 = vld [vmem:[#allocation4 + $0x1f8] sm:$0xf0]  ;;  %v1772_v4 = vld [vmem:[#allocation4 + $0x118] sm:$0xf] }
  0xf2   : > { %1140 = vmatpush.bf16.msrb.mxu0 %v1729_v49  ;;  %v1873_v33 = vor.u32 %v1943_v30, %v1870_v32  ;;  %1224 = vmatpush.bf16.msrb.mxu3 %v1837_v45  ;;  %v1773_v9 = vor.u32 %v1923_v6, %v1772_v4  ;;  %v1732_v30 = vld [vmem:[#allocation4 + $0xd0] sm:$0xf]  ;;  %v1891_v4 = vld [vmem:[#allocation4 + $0x34] sm:$0xf0] }
  0xf3   : > { %v544_v36 = vadd.f32 %v2306_v42, %v532_v34  ;;  %v1684_v42 = vld [vmem:[#allocation4 + $0x80] sm:$0xf]  ;;  %v2342_v34 = vld [vmem:[%s2500_s4] ss:$0 sm:$0xff]  ;;  %v1645_v6 = vor.u32 %v1891_v4, %v1644_v3 }
  0xf4   : > { %v1685_v52 = vor.u32 %v1904_v50, %v1684_v42 }
  0xf5   : > { %v552_v37 = vmax.f32 %v544_v36, 0.0  ;;  %1085 = vmatpush.bf16.msra.mxu2 %v1625_v16  ;;  %v1860_v36 = vld [vmem:[#allocation4 + $0x1d0] sm:$0xf]  ;;  %v1734_v16 = vld [vmem:[#allocation4 + $0xf0] sm:$0xf0] }
  0xf6   : > { %1054 = vmatpush.bf16.msrb.mxu1 %v1685_v52  ;;  %1141 = vmatpush.bf16.msrb.mxu0 %v1697_v60  ;;  %v1938_v52 = vld [vmem:[#allocation4 + $0x1ac] sm:$0xf0]  ;;  %v1927_v60 = vld [vmem:[#allocation4 + $0x15c] sm:$0xf] }
  0xf7   : > { %v556_v39 = vpack.c.bf16 %v552_v37, %v551_v38  ;;  %v1946_v37 = vld [vmem:[#allocation4 + $0x1ec] sm:$0xf0]  ;;  %v1934_v38 = vld [vmem:[#allocation4 + $0x194] sm:$0xf]  ;;  %v1829_v54 = vor.u32 %v1938_v52, %v1828_v51  ;;  %v1809_v62 = vor.u32 %v1927_v60, %v1806_v61  ;;  %1225 = vmatpush.bf16.msrb.mxu3 %v1805_v59  ;;  %v1676_v52 = vld [vmem:[#allocation4 + $0x58] sm:$0xf] }
  0xf8   : > { %v1861_v27 = vor.u32 %v1946_v37, %v1860_v36  ;;  %v1833_v44 = vor.u32 %v1934_v38, %v1830_v40  ;;  %v1702_v36 = vld [vmem:[#allocation4 + $0xb0] sm:$0xf0]  ;;  %v1677_v57 = vor.u32 %v1899_v53, %v1676_v52  ;;  %v1678_v59 = vld [vmem:[#allocation4 + $0x78] sm:$0xf0]  ;;  %v1668_v61 = vld [vmem:[#allocation4 + $0x50] sm:$0xf] }
  0xf9   : > { %1617 = vmatmul.msk.bf16.gmra.mxu1 %vm593_vm0, %v556_v39  ;;  %1194 = vmatpush.bf16.msrb.mxu2 %v1865_v24  ;;  %v1670_v51 = vld [vmem:[#allocation4 + $0x70] sm:$0xf0] }
  0xfa   : > { %1055 = vmatpush.bf16.msrb.mxu1 %v1653_v0  ;;  %1142 = vmatpush.bf16.msrb.mxu0 %v1665_v8  ;;  %v1930_v0 = vld [vmem:[#allocation4 + $0x16c] sm:$0xf0]  ;;  %v1774_v8 = vld [vmem:[#allocation4 + $0x138] sm:$0xf0] }
  0xfb   : > { %v1797_v1 = vor.u32 %v1930_v0, %v1796_v63  ;;  %v1777_v10 = vor.u32 %v1919_v7, %v1774_v8  ;;  %1226 = vmatpush.bf16.msrb.mxu3 %v1773_v9  ;;  %v1886_v63 = vld [vmem:[#allocation4 + $0x14] sm:$0xf]  ;;  %v1636_v7 = vld [vmem:[#allocation4 + $0x10] sm:$0xf]  ;;  %v1887_v9 = vld [vmem:[#allocation4 + $0x1c] sm:$0xf] }
  0xfc   : > { %v1890_v8 = vld [vmem:[#allocation4 + $0x2c] sm:$0xf0] }
  0xfd   : > { %1195 = vmatpush.bf16.msrb.mxu2 %v1833_v44 }
  0xfe   : > { %1056 = vmatpush.bf16.msrb.mxu1 %v1621_v12  ;;  %1143 = vmatpush.bf16.msrb.mxu0 %v1633_v20  ;;  %v1922_v12 = vld [vmem:[#allocation4 + $0x12c] sm:$0xf0]  ;;  %v1737_v20 = vor.u32 %v1910_v13, %v1734_v16 }
  0xff   : > { %v1765_v15 = vor.u32 %v1922_v12, %v1764_v11  ;;  %1227 = vmatpush.bf16.msrb.mxu3 %v1741_v21  ;;  %v1637_v12 = vor.u32 %v1890_v8, %v1636_v7 }
 0x101   : > { %1196 = vmatpush.bf16.msrb.mxu2 %v1801_v58  ;;  %v1895_v58 = vld [vmem:[#allocation4 + $0x5c] sm:$0xf] }
 0x102   : > { %1252 = vmatpush.bf16.msra.mxu0 %v1873_v33  ;;  %1165 = vmatpush.bf16.msra.mxu1 %v1861_v27  ;;  %v1914_v33 = vld [vmem:[#allocation4 + $0xec] sm:$0xf0]  ;;  %v1907_v27 = vld [vmem:[#allocation4 + $0xb4] sm:$0xf0]  ;;  %v1681_v60 = vor.u32 %v1895_v58, %v1678_v59 }
 0x103   : > { %v1733_v37 = vor.u32 %v1914_v33, %v1732_v30 }
 0x105   : > { %1197 = vmatpush.bf16.msrb.mxu2 %v1769_v5  ;;  %v1641_v5 = vor.u32 %v1886_v63, %v1638_v2 }
 0x106   : > { %1253 = vmatpush.bf16.msra.mxu0 %v1841_v31  ;;  %1166 = vmatpush.bf16.msra.mxu1 %v1829_v54  ;;  %v1700_v31 = vld [vmem:[#allocation4 + $0x90] sm:$0xf] }
 0x109   : > { %1198 = vmatpush.bf16.msrb.mxu2 %v1737_v20 }
 0x10a   : > { %1254 = vmatpush.bf16.msra.mxu0 %v1809_v62  ;;  %1167 = vmatpush.bf16.msra.mxu1 %v1797_v1  ;;  %v1898_v62 = vld [vmem:[#allocation4 + $0x6c] sm:$0xf0] }
 0x10b   : > { %v1669_v1 = vor.u32 %v1898_v62, %v1668_v61 }
 0x10e   : > { %1255 = vmatpush.bf16.msra.mxu0 %v1777_v10  ;;  %1168 = vmatpush.bf16.msra.mxu1 %v1765_v15  ;;  %v1646_v10 = vld [vmem:[#allocation4 + $0x38] sm:$0xf0] }
 0x10f   : > { %v1649_v11 = vor.u32 %v1887_v9, %v1646_v10 }
 0x112   : > { %1169 = vmatpush.bf16.msra.mxu1 %v1733_v37 }
 0x139   : > { %v615_v28 = vpop.f32.mrf.mxu0 }
 0x13a   : > { %v616_v35 = vadd.f32 %v2342_v34, %v615_v28  ;;  %v1911_v28 = vld [vmem:[#allocation4 + $0xdc] sm:$0xf] }
 0x13b   : > { %v1745_v32 = vor.u32 %v1911_v28, %v1742_v29 }
 0x13c   : > { %v635_v48 = vmax.f32 %v616_v35, 0.0  ;;  %v1902_v35 = vld [vmem:[#allocation4 + $0x94] sm:$0xf] }
 0x13d   : > { %v1705_v38 = vor.u32 %v1902_v35, %v1702_v36  ;;  %1256 = vmatpush.bf16.msra.mxu0 %v1745_v32 }
 0x13f   : > { %1199 = vmatpush.bf16.msrb.mxu2 %v1705_v38 }
 0x141   : > { %v617_v39 = vpop.f32.mrf.mxu0 }
 0x142   : > { %v618_v26 = vadd.f32 %v2342_v34, %v617_v39  ;;  %v1708_v39 = vld [vmem:[#allocation4 + $0x98] sm:$0xf] }
 0x143   : > { %v1709_v40 = vor.u32 %v1907_v27, %v1708_v39 }
 0x144   : > { %v636_v49 = vmax.f32 %v618_v26, 0.0  ;;  %v1710_v26 = vld [vmem:[#allocation4 + $0xb8] sm:$0xf0] }
 0x145   : > { %1228 = vmatpush.bf16.msrb.mxu3 %v1709_v40  ;;  %v1713_v45 = vor.u32 %v1903_v43, %v1710_v26 }
 0x146   : > { %v2346_v42 = vpack.c.bf16 %v636_v49, %v635_v48  ;;  %v1906_v48 = vld [vmem:[#allocation4 + $0xac] sm:$0xf0]  ;;  %v1894_v49 = vld [vmem:[#allocation4 + $0x54] sm:$0xf] }
 0x147   : > { %1257 = vmatpush.bf16.msra.mxu0 %v1713_v45  ;;  %v1673_v56 = vor.u32 %v1894_v49, %v1670_v51 }
 0x148   : > { %1057 = vmatmul.bf16.vlgmr.msrb.gmra.mxu1 %v2346_v42  ;;  %1086 = vmatmul.bf16.vlgmr.msra.gmra.mxu2 %v2346_v42 }
 0x149   : > { %1115 = vmatmul.bf16.vlgmr.msra.gmra.mxu3 %v2346_v42  ;;  %1144 = vmatmul.bf16.vlgmr.msrb.gmra.mxu0 %v2346_v42 }
 0x14a   : > { %v620_v50 = vpop.f32.mrf.mxu0  ;;  %1200 = vmatpush.bf16.msrb.mxu2 %v1673_v56  ;;  %1229 = vmatpush.bf16.msrb.mxu3 %v1677_v57 }
 0x14b   : > { %v621_v14 = vadd.f32 %v2342_v34, %v620_v50  ;;  %v1701_v50 = vor.u32 %v1906_v48, %v1700_v31  ;;  %1258 = vmatpush.bf16.msra.mxu0 %v1681_v60 }
 0x14d   : > { %v637_v23 = vmax.f32 %v621_v14, 0.0  ;;  %1170 = vmatpush.bf16.msra.mxu1 %v1701_v50 }
 0x14e   : > { %1201 = vmatpush.bf16.msrb.mxu2 %v1641_v5  ;;  %1230 = vmatpush.bf16.msrb.mxu3 %v1645_v6 }
 0x14f   : > { %1259 = vmatpush.bf16.msra.mxu0 %v1649_v11 }
 0x151   : > { %1171 = vmatpush.bf16.msra.mxu1 %v1669_v1 }
 0x152   : > { %v622_v19 = vpop.f32.mrf.mxu0 }
 0x153   : > { %v623_v22 = vadd.f32 %v2342_v34, %v622_v19 }
 0x155   : > { %v638_v24 = vmax.f32 %v623_v22, 0.0  ;;  %1172 = vmatpush.bf16.msra.mxu1 %v1637_v12 }
 0x157   : > { %v2354_v25 = vpack.c.bf16 %v638_v24, %v637_v23 }
 0x159   : > { %1062 = vmatmul.bf16.gmra.mxu1 %v2354_v25  ;;  %1091 = vmatmul.bf16.gmra.mxu2 %v2354_v25 }
 0x15a   : > { %1120 = vmatmul.bf16.gmra.mxu3 %v2354_v25  ;;  %1149 = vmatmul.bf16.gmra.mxu0 %v2354_v25 }
 0x15d   : > { %v625_v41 = vpop.f32.mrf.mxu1 }
 0x15e   : > { %v626_v44 = vadd.f32 %v2342_v34, %v625_v41  ;;  %v2379_v41 = vld [vmem:[%s2502_s6] sm:$0xff] }
 0x15f   : > { %v2382_v43 = vperm.slane %v2379_v41, 1  ;;  %v2385_v26 = vperm.slane %v2379_v41, 2  ;;  %v713_v53 = vperm.slane %v2379_v41, 0 }
 0x160   : > { %v639_v54 = vmax.f32 %v626_v44, 0.0 }
 0x165   : > { %v627_v46 = vpop.f32.mrf.mxu1 }
 0x166   : > { %v628_v47 = vadd.f32 %v2342_v34, %v627_v46 }
 0x168   : > { %v640_v55 = vmax.f32 %v628_v47, 0.0  ;;  %v716_v47 = vperm.slane %v2379_v41, 3 }
 0x16a   : > { %v645_v0 = vpack.c.bf16 %v640_v55, %v639_v54 }
 0x16c   : > { %1067 = vmatmul.bf16.gmra.mxu1 %v645_v0  ;;  %1096 = vmatmul.bf16.gmra.mxu2 %v645_v0 }
 0x16d   : > { %1125 = vmatmul.bf16.gmra.mxu3 %v645_v0  ;;  %1154 = vmatmul.bf16.gmra.mxu0 %v645_v0 }
 0x176   : > { %v630_v13 = vpop.f32.mrf.mxu1 }
 0x177   : > { %v631_v14 = vadd.f32 %v2342_v34, %v630_v13 }
 0x179   : > { %v641_v17 = vmax.f32 %v631_v14, 0.0 }
 0x17e   : > { %v632_v15 = vpop.f32.mrf.mxu1 }
 0x17f   : > { %v633_v16 = vadd.f32 %v2342_v34, %v632_v15 }
 0x181   : > { %v642_v18 = vmax.f32 %v633_v16, 0.0 }
 0x183   : > { %v646_v19 = vpack.c.bf16 %v642_v18, %v641_v17 }
 0x185   : > { %1072 = vmatmul.bf16.gmra.mxu1 %v646_v19  ;;  %1101 = vmatmul.bf16.gmra.mxu2 %v646_v19 }
 0x186   : > { %1130 = vmatmul.bf16.gmra.mxu3 %v646_v19  ;;  %1159 = vmatmul.bf16.gmra.mxu0 %v646_v19 }
 0x195   : > { %1173 = vmatmul.bf16.vlgmr.msra.gmra.mxu1 %v2346_v42  ;;  %1202 = vmatmul.bf16.vlgmr.msrb.gmra.mxu2 %v2346_v42 }
 0x196   : > { %1231 = vmatmul.bf16.vlgmr.msrb.gmra.mxu3 %v2346_v42  ;;  %1260 = vmatmul.bf16.vlgmr.msra.gmra.mxu0 %v2346_v42 }
 0x1a5   : > { %1178 = vmatmul.bf16.gmra.mxu1 %v2354_v25  ;;  %1207 = vmatmul.bf16.gmra.mxu2 %v2354_v25 }
 0x1a6   : > { %1236 = vmatmul.bf16.gmra.mxu3 %v2354_v25  ;;  %1265 = vmatmul.bf16.gmra.mxu0 %v2354_v25 }
 0x1b5   : > { %1183 = vmatmul.bf16.gmra.mxu1 %v645_v0  ;;  %1212 = vmatmul.bf16.gmra.mxu2 %v645_v0 }
 0x1b6   : > { %1241 = vmatmul.bf16.gmra.mxu3 %v645_v0  ;;  %1270 = vmatmul.bf16.gmra.mxu0 %v645_v0 }
 0x1c5   : > { %1188 = vmatmul.bf16.gmra.mxu1 %v646_v19  ;;  %1217 = vmatmul.bf16.gmra.mxu2 %v646_v19  ;;  %v1058_v34 = vpop.f32.mrf.mxu1 }
 0x1c6   : > { %1246 = vmatmul.bf16.gmra.mxu3 %v646_v19  ;;  %1275 = vmatmul.bf16.gmra.mxu0 %v646_v19  ;;  %v1145_v20 = vpop.f32.mrf.mxu0  ;;  %v1059_v4 = vadd.f32 %v1058_v34, %v713_v53 }
 0x1c7   : > { %v1146_v56 = vadd.f32 %v1145_v20, %v716_v47 }
 0x1cb   : > { %v1087_v21 = vpop.f32.mrf.mxu2 }
 0x1cc   : > { %v1116_v42 = vpop.f32.mrf.mxu3  ;;  %v1088_v48 = vadd.f32 %v1087_v21, %v2382_v43 }
 0x1cd   : > { %v1060_v22 = vpop.f32.mrf.mxu1  ;;  %v1117_v50 = vadd.f32 %v1116_v42, %v2385_v26 }
 0x1ce   : > { %v1147_v23 = vpop.f32.mrf.mxu0  ;;  %v1061_v61 = vadd.f32 %v1060_v22, %v713_v53 }
 0x1cf   : > { %v1148_v51 = vadd.f32 %v1147_v23, %v716_v47 }
 0x1d0   : > { %v1281_v10 = vmax.f32 %v1059_v4, %v1061_v61 }
 0x1d1   : > { %v1308_v0 = vmax.f32 %v1146_v56, %v1148_v51 }
 0x1d3   : > { %v1089_v24 = vpop.f32.mrf.mxu2 }
 0x1d4   : > { %v1118_v28 = vpop.f32.mrf.mxu3  ;;  %v1090_v45 = vadd.f32 %v1089_v24, %v2382_v43 }
 0x1d5   : > { %v1119_v31 = vadd.f32 %v1118_v28, %v2385_v26 }
 0x1d6   : > { %v1063_v29 = vpop.f32.mrf.mxu1  ;;  %v1290_v54 = vmax.f32 %v1088_v48, %v1090_v45 }
 0x1d7   : > { %v1150_v30 = vpop.f32.mrf.mxu0  ;;  %v1299_v57 = vmax.f32 %v1117_v50, %v1119_v31  ;;  %v1064_v5 = vadd.f32 %v1063_v29, %v713_v53 }
 0x1d8   : > { %v1151_v58 = vadd.f32 %v1150_v30, %v716_v47 }
 0x1d9   : > { %v1282_v15 = vmax.f32 %v1281_v10, %v1064_v5 }
 0x1da   : > { %v1309_v8 = vmax.f32 %v1308_v0, %v1151_v58 }
 0x1dc   : > { %v1092_v32 = vpop.f32.mrf.mxu2 }
 0x1dd   : > { %v1121_v25 = vpop.f32.mrf.mxu3  ;;  %v1093_v49 = vadd.f32 %v1092_v32, %v2382_v43 }
 0x1de   : > { %v1065_v33 = vpop.f32.mrf.mxu1  ;;  %v1122_v52 = vadd.f32 %v1121_v25, %v2385_v26 }
 0x1df   : > { %v1152_v35 = vpop.f32.mrf.mxu0  ;;  %v1291_v62 = vmax.f32 %v1290_v54, %v1093_v49  ;;  %v1066_v11 = vadd.f32 %v1065_v33, %v713_v53 }
 0x1e0   : > { %v1300_v1 = vmax.f32 %v1299_v57, %v1122_v52  ;;  %v1153_v2 = vadd.f32 %v1152_v35, %v716_v47 }
 0x1e1   : > { %v1283_v22 = vmax.f32 %v1282_v15, %v1066_v11 }
 0x1e2   : > { %v1310_v13 = vmax.f32 %v1309_v8, %v1153_v2 }
 0x1e4   : > { %v1094_v36 = vpop.f32.mrf.mxu2  ;;  %v1311_v24 = vrot.slane %v1310_v13, 4 }
 0x1e5   : > { %v1123_v37 = vpop.f32.mrf.mxu3  ;;  %v1095_v55 = vadd.f32 %v1094_v36, %v2382_v43 }
 0x1e6   : > { %v1124_v59 = vadd.f32 %v1123_v37, %v2385_v26  ;;  %v1312_v48 = vmax.f32 %v1310_v13, %v1311_v24 }
 0x1e7   : > { %v1292_v6 = vmax.f32 %v1291_v62, %v1095_v55 }
 0x1e8   : > { %v1301_v9 = vmax.f32 %v1300_v1, %v1124_v59  ;;  %v1313_v62 = vrot.slane %v1312_v48, 2 }
 0x1e9   : > { %v1068_v38 = vpop.f32.mrf.mxu1  ;;  %v1293_v16 = vrot.slane %v1292_v6, 4 }
 0x1ea   : > { %v1155_v39 = vpop.f32.mrf.mxu0  ;;  %v1069_v17 = vadd.f32 %v1068_v38, %v713_v53  ;;  %v1302_v19 = vrot.slane %v1301_v9, 4  ;;  %v1314_v11 = vmax.f32 %v1312_v48, %v1313_v62 }
 0x1eb   : > { %v1156_v20 = vadd.f32 %v1155_v39, %v716_v47  ;;  %v1294_v30 = vmax.f32 %v1292_v6, %v1293_v16  ;;  %v1284_v39 = vrot.slane %v1283_v22, 4 }
 0x1ec   : > { %v1303_v36 = vmax.f32 %v1301_v9, %v1302_v19 }
 0x1ed   : > { %v1295_v54 = vrot.slane %v1294_v30, 2  ;;  %v1285_v58 = vmax.f32 %v1283_v22, %v1284_v39 }
 0x1ee   : > { %v1304_v55 = vrot.slane %v1303_v36, 2 }
 0x1ef   : > { %v2372_v27 = vpop.f32.mrf.mxu2  ;;  %v1296_v4 = vmax.f32 %v1294_v30, %v1295_v54  ;;  %v1286_v10 = vrot.slane %v1285_v58, 2 }
 0x1f0   : > { %v2374_v40 = vpop.f32.mrf.mxu3  ;;  %v1098_v45 = vadd.f32 %v2372_v27, %v2382_v43  ;;  %v1305_v5 = vmax.f32 %v1303_v36, %v1304_v55 }
 0x1f1   : > { %v1070_v44 = vpop.f32.mrf.mxu1  ;;  %v1127_v49 = vadd.f32 %v2374_v40, %v2385_v26 }
 0x1f2   : > { %v1157_v46 = vpop.f32.mrf.mxu0  ;;  %v1071_v12 = vadd.f32 %v1070_v44, %v713_v53  ;;  %v1306_v15 = vrot.slane %v1305_v5, 1 }
 0x1f3   : > { %v1158_v14 = vadd.f32 %v1157_v46, %v716_v47 }
 0x1f4   : > { %v1353_v34 = vmax.f32 %v1069_v17, %v1071_v12 }
 0x1f5   : > { %v1380_v28 = vmax.f32 %v1156_v20, %v1158_v14  ;;  %v1297_v14 = vrot.slane %v1296_v4, 1  ;;  %v1287_v20 = vmax.f32 %v1285_v58, %v1286_v10 }
 0x1f7   : > { %v1099_v60 = vpop.f32.mrf.mxu2 }
 0x1f8   : > { %v1128_v63 = vpop.f32.mrf.mxu3  ;;  %v1100_v32 = vadd.f32 %v1099_v60, %v2382_v43 }
 0x1f9   : > { %v1129_v37 = vadd.f32 %v1128_v63, %v2385_v26 }
 0x1fa   : > { %v1362_v52 = vmax.f32 %v1098_v45, %v1100_v32 }
 0x1fb   : > { %v1371_v56 = vmax.f32 %v1127_v49, %v1129_v37 }
 0x202   : > { %v1073_v3 = vpop.f32.mrf.mxu1 }
 0x203   : > { %v1160_v7 = vpop.f32.mrf.mxu0  ;;  %v1074_v18 = vadd.f32 %v1073_v3, %v713_v53 }
 0x204   : > { %v1161_v21 = vadd.f32 %v1160_v7, %v716_v47 }
 0x205   : > { %v1354_v25 = vmax.f32 %v1353_v34, %v1074_v18 }
 0x206   : > { %v1381_v38 = vmax.f32 %v1380_v28, %v1161_v21  ;;  %v1315_v21 = vrot.slane %v1314_v11, 1  ;;  %v1298_v28 = vmax.f32 %v1296_v4, %v1297_v14  ;;  %v2437_v14 = vperm.slane %v2379_v41, 6 }
 0x208   : > { %v1102_v42 = vpop.f32.mrf.mxu2 }
 0x209   : > { %v1131_v23 = vpop.f32.mrf.mxu3  ;;  %v1103_v46 = vadd.f32 %v1102_v42, %v2382_v43 }
 0x20a   : > { %v1075_v29 = vpop.f32.mrf.mxu1  ;;  %v1132_v50 = vadd.f32 %v1131_v23, %v2385_v26 }
 0x20b   : > { %v1076_v33 = vadd.f32 %v1075_v29, %v713_v53  ;;  %v1162_v35 = vpop.f32.mrf.mxu0  ;;  %v1363_v59 = vmax.f32 %v1362_v52, %v1103_v46  ;;  %v1307_v29 = vmax.f32 %v1305_v5, %v1306_v15 }
 0x20c   : > { %v1163_v44 = vadd.f32 %v1162_v35, %v716_v47  ;;  %v1372_v63 = vmax.f32 %v1371_v56, %v1132_v50  ;;  %v1316_v35 = vmax.f32 %v1314_v11, %v1315_v21 }
 0x20d   : > { %v1355_v31 = vmax.f32 %v1354_v25, %v1076_v33  ;;  %v1288_v33 = vrot.slane %v1287_v20, 1  ;;  %v1444_v39 = vrot.slane %v1307_v29, 4  ;;  %v717_v29 = vperm.slane %v2379_v41, 4 }
 0x20e   : > { %v1382_v51 = vmax.f32 %v1381_v38, %v1163_v44  ;;  %v1443_v44 = vrot.slane %v1298_v28, 6 }
 0x20f   : > { %v1356_v53 = vrot.slane %v1355_v31, 4  ;;  %v1289_v50 = vmax.f32 %v1287_v20, %v1288_v33 }
 0x210   : > { %v1383_v47 = vrot.slane %v1382_v51, 4  ;;  %v1104_v57 = vpop.f32.mrf.mxu2 }
 0x211   : > { %v1357_v27 = vmax.f32 %v1355_v31, %v1356_v53  ;;  %v1105_v60 = vadd.f32 %v1104_v57, %v2382_v43  ;;  %v1133_v61 = vpop.f32.mrf.mxu3 }
 0x212   : > { %v1384_v0 = vmax.f32 %v1382_v51, %v1383_v47  ;;  %v1134_v40 = vadd.f32 %v1133_v61, %v2385_v26  ;;  %v2407_v1 = vpop.f32.mrf.mxu1  ;;  %v1445_v51 = vrot.slane %v1316_v35, 2  ;;  %v1456_v47 = vsel %vm1455_vm1, %v1289_v50, %v1443_v44 }
 0x213   : > { %v1364_v2 = vmax.f32 %v1363_v59, %v1105_v60  ;;  %v2409_v3 = vpop.f32.mrf.mxu0  ;;  %v1358_v8 = vrot.slane %v1357_v27, 2 }
 0x214   : > { %v1385_v6 = vrot.slane %v1384_v0, 2  ;;  %v1373_v7 = vmax.f32 %v1372_v63, %v1134_v40  ;;  %v1458_v57 = vsel %vm1457_vm2, %v1444_v39, %v1445_v51  ;;  %v1425_v63 = vld [vmem:[#allocation2] sm:$0xff] }
 0x215   : > { %v1365_v9 = vrot.slane %v1364_v2, 4  ;;  %v1359_v17 = vmax.f32 %v1357_v27, %v1358_v8  ;;  %v1460_v60 = vsel %vm1459_vm3, %v1456_v47, %v1458_v57 }
 0x216   : > { %v1386_v43 = vmax.f32 %v1384_v0, %v1385_v6  ;;  %v1374_v12 = vrot.slane %v1373_v7, 4 }
 0x217   : > { %v1366_v13 = vmax.f32 %v1364_v2, %v1365_v9  ;;  %v1360_v32 = vrot.slane %v1359_v17, 1 }
 0x218   : > { %v1375_v16 = vmax.f32 %v1373_v7, %v1374_v12  ;;  %v2411_v26 = vpop.f32.mrf.mxu2  ;;  %v1387_v42 = vrot.slane %v1386_v43, 1  ;;  %v2432_v12 = vperm.slane %v2379_v41, 5 }
 0x219   : > { %v1367_v18 = vrot.slane %v1366_v13, 2  ;;  %v2413_v19 = vpop.f32.mrf.mxu3  ;;  %v1361_v31 = vmax.f32 %v1359_v17, %v1360_v32 }
 0x21a   : > { %v1376_v22 = vrot.slane %v1375_v16, 2  ;;  %v2415_v34 = vpop.f32.mrf.mxu1  ;;  %v1388_v36 = vmax.f32 %v1386_v43, %v1387_v42  ;;  %v1204_v21 = vadd.f32 %v2411_v26, %v2432_v12 }
 0x21b   : > { %v1368_v23 = vmax.f32 %v1366_v13, %v1367_v18  ;;  %v2417_v24 = vpop.f32.mrf.mxu0  ;;  %v720_v18 = vperm.slane %v2379_v41, 7  ;;  %v1175_v41 = vadd.f32 %v2407_v1, %v717_v29 }
 0x21c   : > { %v1377_v30 = vmax.f32 %v1375_v16, %v1376_v22  ;;  %v1451_v52 = vrot.slane %v1388_v36, 2  ;;  %v1233_v22 = vadd.f32 %v2413_v19, %v2437_v14 }
 0x21d   : > { %v1369_v25 = vrot.slane %v1368_v23, 1 }
 0x21e   : > { %v1378_v37 = vrot.slane %v1377_v30, 1 }
 0x21f   : > { %v1370_v38 = vmax.f32 %v1368_v23, %v1369_v25  ;;  %v1264_v23 = vadd.f32 %v2417_v24, %v720_v18  ;;  %v1262_v25 = vadd.f32 %v2409_v3, %v720_v18 }
 0x220   : > { %v1379_v45 = vmax.f32 %v1377_v30, %v1378_v37  ;;  %v1205_v46 = vpop.f32.mrf.mxu2  ;;  %v1177_v37 = vadd.f32 %v2415_v34, %v717_v29 }
 0x221   : > { %v1449_v48 = vrot.slane %v1370_v38, 6  ;;  %v1234_v49 = vpop.f32.mrf.mxu3  ;;  %v1206_v16 = vadd.f32 %v1205_v46, %v2432_v12  ;;  %v1344_v44 = vmax.f32 %v1262_v25, %v1264_v23 }
 0x222   : > { %v1450_v53 = vrot.slane %v1379_v45, 4  ;;  %v1179_v54 = vpop.f32.mrf.mxu1  ;;  %v1235_v20 = vadd.f32 %v1234_v49, %v2437_v14  ;;  %v1317_v50 = vmax.f32 %v1175_v41, %v1177_v37 }
 0x223   : > { %v1464_v55 = vsel %vm1455_vm1, %v1361_v31, %v1449_v48  ;;  %v1266_v56 = vpop.f32.mrf.mxu0  ;;  %v1326_v30 = vmax.f32 %v1204_v21, %v1206_v16  ;;  %v1180_v46 = vadd.f32 %v1179_v54, %v717_v29 }
 0x224   : > { %v1465_v58 = vsel %vm1457_vm2, %v1450_v53, %v1451_v52  ;;  %v1335_v33 = vmax.f32 %v1233_v22, %v1235_v20  ;;  %v1267_v35 = vadd.f32 %v1266_v56, %v720_v18 }
 0x225   : > { %v1466_v59 = vsel %vm1459_vm3, %v1464_v55, %v1465_v58  ;;  %v1318_v56 = vmax.f32 %v1317_v50, %v1180_v46 }
 0x226   : > { %v1474_v27 = vrot.slane %v1466_v59, 7  ;;  %v1345_v49 = vmax.f32 %v1344_v44, %v1267_v35 }
 0x228   : > { %v1476_v61 = vsel %vm1475_vm4, %v1474_v27, %v1460_v60  ;;  %v1208_v62 = vpop.f32.mrf.mxu2 }
 0x229   : > { %v1478_v0 = vsel %vm1477_vm5, %v1474_v27, %v1476_v61  ;;  %v1237_v40 = vpop.f32.mrf.mxu3  ;;  %v1209_v42 = vadd.f32 %v1208_v62, %v2432_v12 }
 0x22a   : > { %v1480_v2 = vsel %vm1479_vm6, %v1474_v27, %v1478_v0  ;;  %v1181_v4 = vpop.f32.mrf.mxu1  ;;  %v1238_v28 = vadd.f32 %v1237_v40, %v2437_v14 }
 0x22b   : > { %v1482_v5 = vsel %vm1481_vm7, %v1474_v27, %v1480_v2  ;;  %v1268_v6 = vpop.f32.mrf.mxu0  ;;  %v1327_v38 = vmax.f32 %v1326_v30, %v1209_v42  ;;  %v1182_v51 = vadd.f32 %v1181_v4, %v717_v29 }
 0x22c   : > { %v1492_v7 = vmax.f32 %v1425_v63, %v1482_v5  ;;  %v1336_v24 = vmax.f32 %v1335_v33, %v1238_v28  ;;  %v1269_v39 = vadd.f32 %v1268_v6, %v720_v18 }
 0x22d   : > { %v1319_v61 = vmax.f32 %v1318_v56, %v1182_v51 }
 0x22e   : > { %1494 = vst [vmem:[#allocation2] sm:$0xff] %v1492_v7  ;;  %v1346_v53 = vmax.f32 %v1345_v49, %v1269_v39 }
 0x230   : > { %v1210_v8 = vpop.f32.mrf.mxu2  ;;  %v1347_v62 = vrot.slane %v1346_v53, 4 }
 0x231   : > { %v1239_v9 = vpop.f32.mrf.mxu3  ;;  %v1211_v32 = vadd.f32 %v1210_v8, %v2432_v12 }
 0x232   : > { %v1184_v10 = vpop.f32.mrf.mxu1  ;;  %v1240_v26 = vadd.f32 %v1239_v9, %v2437_v14  ;;  %v1348_v20 = vmax.f32 %v1346_v53, %v1347_v62 }
 0x233   : > { %v1271_v11 = vpop.f32.mrf.mxu0  ;;  %v1328_v31 = vmax.f32 %v1327_v38, %v1211_v32  ;;  %v1185_v47 = vadd.f32 %v1184_v10, %v717_v29 }
 0x234   : > { %v1337_v3 = vmax.f32 %v1336_v24, %v1240_v26  ;;  %v1272_v59 = vadd.f32 %v1271_v11, %v720_v18  ;;  %v1320_v11 = vrot.slane %v1319_v61, 4  ;;  %v1349_v37 = vrot.slane %v1348_v20, 2 }
 0x235   : > { %v1329_v34 = vrot.slane %v1328_v31, 4 }
 0x236   : > { %v1338_v58 = vrot.slane %v1337_v3, 4  ;;  %v1321_v33 = vmax.f32 %v1319_v61, %v1320_v11  ;;  %v1350_v49 = vmax.f32 %v1348_v20, %v1349_v37 }
 0x237   : > { %v1330_v40 = vmax.f32 %v1328_v31, %v1329_v34 }
 0x238   : > { %v2429_v43 = vpop.f32.mrf.mxu2  ;;  %v1339_v7 = vmax.f32 %v1337_v3, %v1338_v58 }
 0x239   : > { %v2434_v13 = vpop.f32.mrf.mxu3 }
 0x23a   : > { %v1186_v15 = vpop.f32.mrf.mxu1  ;;  %v1243_v21 = vadd.f32 %v2434_v13, %v2437_v14  ;;  %v1340_v30 = vrot.slane %v1339_v7, 2 }
 0x23b   : > { %v1273_v17 = vpop.f32.mrf.mxu0  ;;  %v1187_v52 = vadd.f32 %v1186_v15, %v717_v29  ;;  %v1214_v15 = vadd.f32 %v2429_v43, %v2432_v12 }
 0x23c   : > { %v1274_v55 = vadd.f32 %v1273_v17, %v720_v18  ;;  %v1341_v39 = vmax.f32 %v1339_v7, %v1340_v30 }
 0x23d   : > { %v1389_v1 = vmax.f32 %v1185_v47, %v1187_v52  ;;  %v1351_v47 = vrot.slane %v1350_v49, 1 }
 0x23e   : > { %v1416_v63 = vmax.f32 %v1272_v59, %v1274_v55 }
 0x23f   : > { %v1352_v62 = vmax.f32 %v1350_v49, %v1351_v47 }
 0x240   : > { %v1215_v36 = vpop.f32.mrf.mxu2 }
 0x241   : > { %v1244_v19 = vpop.f32.mrf.mxu3  ;;  %v1216_v2 = vadd.f32 %v1215_v36, %v2432_v12 }
 0x242   : > { %v1189_v45 = vpop.f32.mrf.mxu1  ;;  %v1245_v8 = vadd.f32 %v1244_v19, %v2437_v14 }
 0x243   : > { %v1276_v48 = vpop.f32.mrf.mxu0  ;;  %v1190_v57 = vadd.f32 %v1189_v45, %v717_v29  ;;  %v1398_v23 = vmax.f32 %v1214_v15, %v1216_v2 }
 0x244   : > { %v1277_v27 = vadd.f32 %v1276_v48, %v720_v18  ;;  %v1407_v32 = vmax.f32 %v1243_v21, %v1245_v8  ;;  %v1322_v48 = vrot.slane %v1321_v33, 2 }
 0x245   : > { %v1390_v4 = vmax.f32 %v1389_v1, %v1190_v57 }
 0x246   : > { %v1417_v9 = vmax.f32 %v1416_v63, %v1277_v27  ;;  %v1323_v34 = vmax.f32 %v1321_v33, %v1322_v48 }
 0x248   : > { %v1218_v60 = vpop.f32.mrf.mxu2 }
 0x249   : > { %v1247_v54 = vpop.f32.mrf.mxu3  ;;  %v1219_v16 = vadd.f32 %v1218_v60, %v2432_v12 }
 0x24a   : > { %v1191_v0 = vpop.f32.mrf.mxu1  ;;  %v1248_v42 = vadd.f32 %v1247_v54, %v2437_v14  ;;  %v1324_v54 = vrot.slane %v1323_v34, 1 }
 0x24b   : > { %v1192_v5 = vadd.f32 %v1191_v0, %v717_v29  ;;  %v1278_v6 = vpop.f32.mrf.mxu0  ;;  %v1331_v29 = vrot.slane %v1330_v40, 2  ;;  %v1399_v35 = vmax.f32 %v1398_v23, %v1219_v16 }
 0x24c   : > { %v1279_v10 = vadd.f32 %v1278_v6, %v720_v18  ;;  %v1408_v38 = vmax.f32 %v1407_v32, %v1248_v42  ;;  %v1325_v8 = vmax.f32 %v1323_v34, %v1324_v54 }
 0x24d   : > { %v1391_v17 = vmax.f32 %v1390_v4, %v1192_v5  ;;  %v1332_v24 = vmax.f32 %v1330_v40, %v1331_v29 }
 0x24e   : > { %v1418_v22 = vmax.f32 %v1417_v9, %v1279_v10  ;;  %v1448_v9 = vrot.slane %v1352_v62, 2 }
 0x24f   : > { %v1392_v28 = vrot.slane %v1391_v17, 4  ;;  %v1333_v52 = vrot.slane %v1332_v24, 1 }
 0x250   : > { %v1419_v18 = vrot.slane %v1418_v22, 4  ;;  %v1220_v25 = vpop.f32.mrf.mxu2 }
 0x251   : > { %v1393_v43 = vmax.f32 %v1391_v17, %v1392_v28  ;;  %v1221_v26 = vadd.f32 %v1220_v25, %v2432_v12  ;;  %v1249_v36 = vpop.f32.mrf.mxu3  ;;  %v1342_v12 = vrot.slane %v1341_v39, 1  ;;  %v1334_v59 = vmax.f32 %v1332_v24, %v1333_v52  ;;  %v1426_v28 = vld [vmem:[#allocation2 + $0x8] sm:$0xff] }
 0x252   : > { %v1420_v19 = vmax.f32 %v1418_v22, %v1419_v18  ;;  %v1250_v13 = vadd.f32 %v1249_v36, %v2437_v14 }
 0x253   : > { %v1400_v44 = vmax.f32 %v1399_v35, %v1221_v26  ;;  %v1394_v46 = vrot.slane %v1393_v43, 2  ;;  %v1343_v27 = vmax.f32 %v1341_v39, %v1342_v12  ;;  %v1446_v2 = vrot.slane %v1334_v59, 6 }
 0x254   : > { %v1421_v45 = vrot.slane %v1420_v19, 2  ;;  %v1409_v41 = vmax.f32 %v1408_v38, %v1250_v13 }
 0x255   : > { %v1401_v31 = vrot.slane %v1400_v44, 4  ;;  %v1395_v55 = vmax.f32 %v1393_v43, %v1394_v46  ;;  %v1447_v4 = vrot.slane %v1343_v27, 4  ;;  %v1461_v16 = vsel %vm1455_vm1, %v1325_v8, %v1446_v2 }
 0x256   : > { %v1422_v3 = vmax.f32 %v1420_v19, %v1421_v45  ;;  %v1410_v50 = vrot.slane %v1409_v41, 4 }
 0x257   : > { %v1402_v51 = vmax.f32 %v1400_v44, %v1401_v31  ;;  %v1396_v61 = vrot.slane %v1395_v55, 1  ;;  %v1462_v17 = vsel %vm1457_vm2, %v1447_v4, %v1448_v9 }
 0x258   : > { %v1411_v53 = vmax.f32 %v1409_v41, %v1410_v50  ;;  %v1423_v14 = vrot.slane %v1422_v3, 1  ;;  %v1463_v22 = vsel %vm1459_vm3, %v1461_v16, %v1462_v17 }
 0x259   : > { %v1403_v56 = vrot.slane %v1402_v51, 2  ;;  %v1397_v6 = vmax.f32 %v1395_v55, %v1396_v61 }
 0x25a   : > { %v1412_v57 = vrot.slane %v1411_v53, 2  ;;  %v1424_v63 = vmax.f32 %v1422_v3, %v1423_v14 }
 0x25b   : > { %v1404_v58 = vmax.f32 %v1402_v51, %v1403_v56 }
 0x25c   : > { %v1413_v60 = vmax.f32 %v1411_v53, %v1412_v57  ;;  %v1454_v10 = vrot.slane %v1424_v63, 2 }
 0x25d   : > { %v1405_v1 = vrot.slane %v1404_v58, 1 }
 0x25e   : > { %v1414_v0 = vrot.slane %v1413_v60, 1 }
 0x25f   : > { %v1406_v40 = vmax.f32 %v1404_v58, %v1405_v1 }
 0x260   : > { %v1415_v5 = vmax.f32 %v1413_v60, %v1414_v0 }
 0x261   : > { %v1452_v7 = vrot.slane %v1406_v40, 6 }
 0x262   : > { %v1453_v11 = vrot.slane %v1415_v5, 4 }
 0x263   : > { %v1467_v15 = vsel %vm1455_vm1, %v1397_v6, %v1452_v7 }
 0x264   : > { %v1468_v20 = vsel %vm1457_vm2, %v1453_v11, %v1454_v10 }
 0x265   : > { %v1469_v21 = vsel %vm1459_vm3, %v1467_v15, %v1468_v20 }
 0x266   : > { %v1485_v42 = vrot.slane %v1469_v21, 7 }
 0x268   : > { %v1486_v23 = vsel %vm1475_vm4, %v1485_v42, %v1463_v22 }
 0x269   : > { %v1487_v29 = vsel %vm1477_vm5, %v1485_v42, %v1486_v23 }
 0x26a   : > { %v1488_v30 = vsel %vm1479_vm6, %v1485_v42, %v1487_v29  ;;  %1499 = sbr.rel (%p1874_p13) target bundleno = 631 (0x277), region = 98 }
 0x26b   : > { %v1489_v32 = vsel %vm1481_vm7, %v1485_v42, %v1488_v30 }
 0x26c   : > { %v1493_v18 = vmax.f32 %v1426_v28, %v1489_v32 }
 0x26e   : > { %1495 = vst [vmem:[#allocation2 + $0x8] sm:$0xff] %v1493_v18 }
 0x26f   : > { %v1500_v25 = vld [vmem:[#allocation2] sm:$0xff] }
 0x270   : > { %1502 = vst [vmem:[#allocation7] sm:$0xff] %v1500_v25 }
 0x275   : > { %v1501_v33 = vld [vmem:[#allocation2 + $0x8] sm:$0xff] }
 0x276   : > { %1503 = vst [vmem:[#allocation7 + $0x8] sm:$0xff] %v1501_v33 }
 0x277 PF: > { %p1966_p0 = scmp.eq.s32.totalorder %s1587_s29, 2  ;;  %s1515_s12 = sshll.u32 %s2503_s7, 4  ;;  %s1516_s12 = int_to_ptr.hbm [resolvable:$true] %s1515_s12 }
 0x278   : > { %s2149_s18 = smov [#allocation7]  }
 0x279   : > { %s1513_s19 = sshll.u32 %s2149_s18, 4  ;;  %s1514_s19 = int_to_ptr.vmem [resolvable:$true] %s1513_s19 }
 0x27a   : > { %1957 = dma.vmem_to_hbm [thread:$0]  (%p1966_p0), %s1514_s19, 256, %s1516_s12, [#allocation6]  }
 0x27b   : > { %2119 = dma.done.wait (%p1966_p0), [#allocation6], 256  }
 0x27c   : > { %2121 = vsyncadd (%p1966_p0), [#allocation6], 4294967040 }
 0x27d PF: > { %s19_s28 = sadd.s32 1, %s2140_s28   ;;  %s2507_s24 = smov %s2128_s25 }
 0x27e   : > { %p16_p1 = scmp.ge.s32.totalorder %s19_s28, 5   ;;  %s2508_s25 = smov %s2242_s13 }
 0x27f   : > { %s2509_s26 = smov %s2136_s27  ;;  %s2510_s27 = smov %s2512_s30 }
 0x280   :  { %18 = sbr.rel (!%p16_p1) target bundleno = 4 (0x4), region = 132 }
 0x285   :  { %1529 = vsyncpa [#allocation5], 1 }
 0x286   :  { %1531 = vsyncpa [#allocation5 + $0x1], 1 }
 0x287   :  { %1532 = vsyncpa [#allocation6], 1 }
 0x288   :  { %1534 = vsyncpa [#allocation6 + $0x1], 1 }

</bundles_post_ra>
